<compile_context>
chip_gen: v6e
topology: v6e:2x2x1
jax: 0.10.0
libtpu: 0.0.40
codegen_flags: <defaults>
</compile_context>

<pallas_src>
import jax
import jax.numpy as jnp
import numpy as np
from jax.experimental import pallas as pl
from jax.experimental.pallas import tpu as pltpu

_TWO_PI = float(2.0 * np.pi)
# Target bytes per streamed block per array (f32). Total live VMEM is about
# (4 streamed arrays x 2 buffers + 2 resident c/s planes x 2 buffers) * block
# <= ~18 MiB with this setting.
_BLOCK_BYTES = 1536 * 1024
_VMEM_LIMIT_BYTES = 32 * 1024 * 1024


def _modulation_kernel(c_ref, s_ref, xr_ref, xi_ref, or_ref, oi_ref):
    """out = (xr + j*xi) * (c + j*s), elementwise; c/s broadcast over batch dim."""
    c = c_ref[...][None, :, :]
    s = s_ref[...][None, :, :]
    xr = xr_ref[...]
    xi = xi_ref[...]
    or_ref[...] = xr * c - xi * s
    oi_ref[...] = xr * s + xi * c


def _choose_block(B, M, N):
    """Pick (batch_block, row_block) so one f32 block is ~_BLOCK_BYTES."""
    row_bytes = N * 4
    plane_bytes = M * row_bytes
    if plane_bytes <= _BLOCK_BYTES:
        # Whole modulation plane fits: group batch elements per grid step.
        tm = M
        bb = max(1, min(B, _BLOCK_BYTES // plane_bytes))
    else:
        # Plane too big: one batch element per step, tile rows (multiple of 8
        # to satisfy the sublane constraint; edge blocks are masked by Pallas).
        bb = 1
        rows = max(8, (_BLOCK_BYTES // row_bytes) // 8 * 8)
        tm = min(M, rows)
    return bb, tm


def modulation_layer_forward(x_re, x_im, phase_values):
    """Apply phase modulation to a batch of complex fields.

    Args:
      x_re, x_im: (B, M, N) float32 real/imag parts of the input field.
      phase_values: (M, N) float32 trainable phase parameter.

    Returns:
      (out_re, out_im): (B, M, N) float32 real/imag parts of modulated field.
    """
    B, M, N = x_re.shape
    assert x_im.shape == (B, M, N)
    assert phase_values.shape == (M, N)

    # Hoist the transcendentals: computed once per call, not once per tile.
    # exp(j*2*pi*phase) is periodic mod 1 in phase -> wrap first so f32 range
    # reduction stays accurate even if the trained parameter drifts large.
    p = phase_values.astype(jnp.float32)
    p = p - jnp.floor(p)
    ang = _TWO_PI * p
    cos_p = jnp.cos(ang)
    sin_p = jnp.sin(ang)

    bb, tm = _choose_block(B, M, N)
    grid = (pl.cdiv(M, tm), pl.cdiv(B, bb))  # M-tiles outer => c/s tile stays resident

    plane_spec = pl.BlockSpec((tm, N), lambda i, b: (i, 0))
    field_spec = pl.BlockSpec((bb, tm, N), lambda i, b: (b, i, 0))

    out_re, out_im = pl.pallas_call(
        _modulation_kernel,
        out_shape=(
            jax.ShapeDtypeStruct((B, M, N), jnp.float32),
            jax.ShapeDtypeStruct((B, M, N), jnp.float32),
        ),
        grid_spec=pltpu.PrefetchScalarGridSpec(
            num_scalar_prefetch=0,
            grid=grid,
            in_specs=[plane_spec, plane_spec, field_spec, field_spec],
            out_specs=[
                pl.BlockSpec((bb, tm, N), lambda i, b: (b, i, 0)),
                pl.BlockSpec((bb, tm, N), lambda i, b: (b, i, 0)),
            ],
        ),
        compiler_params=pltpu.CompilerParams(
            dimension_semantics=("parallel", "parallel"),
            vmem_limit_bytes=_VMEM_LIMIT_BYTES,
        ),
    )(cos_p, sin_p, x_re.astype(jnp.float32), x_im.astype(jnp.float32))
    return out_re, out_im


if __name__ == "__main__":
    # Small shapes consistent with the module (spec uses M = N = 200), batched fields.
    B, M, N = 2, 200, 200

    key = jax.random.PRNGKey(0)
    k_phase, k_re, k_im = jax.random.split(key, 3)

    # Deterministic parameter init, matching nn.init.uniform_(a=0, b=2).
    phase_values = jax.random.uniform(
        k_phase, (M, N), dtype=jnp.float32, minval=0.0, maxval=2.0
    )

    # Deterministic complex input field (real / imag planes).
    x_re = jax.random.normal(k_re, (B, M, N), dtype=jnp.float32)
    x_im = jax.random.normal(k_im, (B, M, N), dtype=jnp.float32)

    fwd = jax.jit(modulation_layer_forward)
    out_re, out_im = fwd(x_re, x_im, phase_values)
    out_re = jax.block_until_ready(out_re)
    out_im = jax.block_until_ready(out_im)

    # Reference check on host in complex128 (matches the original torch module).
    x_c = np.asarray(x_re).astype(np.float64) + 1j * np.asarray(x_im).astype(np.float64)
    mod = np.exp(1j * 2.0 * np.pi * np.asarray(phase_values).astype(np.float64))
    ref = x_c * mod
    np.testing.assert_allclose(np.asarray(out_re), ref.real, atol=2e-5, rtol=1e-5)
    np.testing.assert_allclose(np.asarray(out_im), ref.imag, atol=2e-5, rtol=1e-5)

    print("KERNEL_OK")
</pallas_src>

<mosaic_0001>
module attributes {stable_mosaic.version = 11 : i64} {
  func.func @_modulation_kernel(%arg0: i32, %arg1: i32, %arg2: memref<200x200xf32, #tpu.memory_space<vmem>>, %arg3: memref<200x200xf32, #tpu.memory_space<vmem>>, %arg4: memref<2x200x200xf32, #tpu.memory_space<vmem>>, %arg5: memref<2x200x200xf32, #tpu.memory_space<vmem>>, %arg6: memref<2x200x200xf32, #tpu.memory_space<vmem>>, %arg7: memref<2x200x200xf32, #tpu.memory_space<vmem>>) attributes {dimension_semantics = [#tpu.dimension_semantics<parallel>, #tpu.dimension_semantics<parallel>], iteration_bounds = array<i64: 1, 1>, scalar_prefetch = 0 : i64, scratch_operands = 0 : i64, tpu.core_type = #tpu.core_type<tc>, window_params = [{transform_indices = @transform_0, window_bounds = array<i64: 200, 200>}, {transform_indices = @transform_1, window_bounds = array<i64: 200, 200>}, {transform_indices = @transform_2, window_bounds = array<i64: 2, 200, 200>}, {transform_indices = @transform_3, window_bounds = array<i64: 2, 200, 200>}, {transform_indices = @transform_4, window_bounds = array<i64: 2, 200, 200>}, {transform_indices = @transform_5, window_bounds = array<i64: 2, 200, 200>}]} {
    %c0 = arith.constant 0 : index
    %c0_0 = arith.constant 0 : index
    %0 = vector.load %arg2[%c0, %c0_0] : memref<200x200xf32, #tpu.memory_space<vmem>>, vector<200x200xf32>
    %1 = vector.shape_cast %0 : vector<200x200xf32> to vector<1x200x200xf32>
    %c0_1 = arith.constant 0 : index
    %c0_2 = arith.constant 0 : index
    %2 = vector.load %arg3[%c0_1, %c0_2] : memref<200x200xf32, #tpu.memory_space<vmem>>, vector<200x200xf32>
    %3 = vector.shape_cast %2 : vector<200x200xf32> to vector<1x200x200xf32>
    %c0_3 = arith.constant 0 : index
    %c0_4 = arith.constant 0 : index
    %c0_5 = arith.constant 0 : index
    %4 = vector.load %arg4[%c0_3, %c0_4, %c0_5] : memref<2x200x200xf32, #tpu.memory_space<vmem>>, vector<2x200x200xf32>
    %c0_6 = arith.constant 0 : index
    %c0_7 = arith.constant 0 : index
    %c0_8 = arith.constant 0 : index
    %5 = vector.load %arg5[%c0_6, %c0_7, %c0_8] : memref<2x200x200xf32, #tpu.memory_space<vmem>>, vector<2x200x200xf32>
    %6 = vector.broadcast %1 : vector<1x200x200xf32> to vector<2x200x200xf32>
    %7 = arith.mulf %4, %6 : vector<2x200x200xf32>
    %8 = vector.broadcast %3 : vector<1x200x200xf32> to vector<2x200x200xf32>
    %9 = arith.mulf %5, %8 : vector<2x200x200xf32>
    %10 = arith.subf %7, %9 : vector<2x200x200xf32>
    %c0_9 = arith.constant 0 : index
    %c0_10 = arith.constant 0 : index
    %c0_11 = arith.constant 0 : index
    %11 = vector.load %arg6[%c0_9, %c0_10, %c0_11] : memref<2x200x200xf32, #tpu.memory_space<vmem>>, vector<2x200x200xf32>
    tpu.vector_store %arg6[%c0_9, %c0_10, %c0_11], %10 {strides = array<i32>} : memref<2x200x200xf32, #tpu.memory_space<vmem>>, vector<2x200x200xf32>,
    %12 = vector.broadcast %3 : vector<1x200x200xf32> to vector<2x200x200xf32>
    %13 = arith.mulf %4, %12 : vector<2x200x200xf32>
    %14 = vector.broadcast %1 : vector<1x200x200xf32> to vector<2x200x200xf32>
    %15 = arith.mulf %5, %14 : vector<2x200x200xf32>
    %16 = arith.addf %13, %15 : vector<2x200x200xf32>
    %c0_12 = arith.constant 0 : index
    %c0_13 = arith.constant 0 : index
    %c0_14 = arith.constant 0 : index
    %17 = vector.load %arg7[%c0_12, %c0_13, %c0_14] : memref<2x200x200xf32, #tpu.memory_space<vmem>>, vector<2x200x200xf32>
    tpu.vector_store %arg7[%c0_12, %c0_13, %c0_14], %16 {strides = array<i32>} : memref<2x200x200xf32, #tpu.memory_space<vmem>>, vector<2x200x200xf32>,
    return
  }
  func.func @transform_0(%arg0: i32, %arg1: i32) -> (i32, i32) {
    %c0_i32 = arith.constant 0 : i32
    %c0_i32_0 = arith.constant 0 : i32
    return %arg0, %c0_i32 : i32, i32
  }
  func.func @transform_1(%arg0: i32, %arg1: i32) -> (i32, i32) {
    %c0_i32 = arith.constant 0 : i32
    %c0_i32_0 = arith.constant 0 : i32
    return %arg0, %c0_i32 : i32, i32
  }
  func.func @transform_2(%arg0: i32, %arg1: i32) -> (i32, i32, i32) {
    %c0_i32 = arith.constant 0 : i32
    %c0_i32_0 = arith.constant 0 : i32
    return %arg1, %arg0, %c0_i32 : i32, i32, i32
  }
  func.func @transform_3(%arg0: i32, %arg1: i32) -> (i32, i32, i32) {
    %c0_i32 = arith.constant 0 : i32
    %c0_i32_0 = arith.constant 0 : i32
    return %arg1, %arg0, %c0_i32 : i32, i32, i32
  }
  func.func @transform_4(%arg0: i32, %arg1: i32) -> (i32, i32, i32) {
    %c0_i32 = arith.constant 0 : i32
    %c0_i32_0 = arith.constant 0 : i32
    return %arg1, %arg0, %c0_i32 : i32, i32, i32
  }
  func.func @transform_5(%arg0: i32, %arg1: i32) -> (i32, i32, i32) {
    %c0_i32 = arith.constant 0 : i32
    %c0_i32_0 = arith.constant 0 : i32
    return %arg1, %arg0, %c0_i32 : i32, i32, i32
  }
}

</mosaic_0001>

<bundles_post_ra>
// kernel: modulation_layer_forward.1
= control target key start
LH: loop header
LB: loop body
LE: loop exit
PB: predicated region body
PF: predicated region fallthrough
CT: control target
= control target key end

     0   :  { %11 = vsyncpa [#allocation3], 0  ;;  %s3547_s0 = inlined_call_operand.vmem [shape: f32[200,200], index: 0, kind: input, shape index: {}]   ;;  %s3548_s1 = inlined_call_operand.vmem [shape: f32[200,200], index: 1, kind: input, shape index: {}]   ;;  %s3549_s2 = inlined_call_operand.vmem [shape: f32[2,200,200], index: 2, kind: input, shape index: {}]   ;;  %s3550_s3 = inlined_call_operand.hbm [shape: f32[2,200,200], index: 3, kind: input, shape index: {}]   ;;  %s3551_s4 = inlined_call_operand.hbm [shape: f32[2,200,200], index: 4, kind: output, shape index: {0}]   ;;  %s3552_s5 = inlined_call_operand.hbm [shape: f32[2,200,200], index: 5, kind: output, shape index: {1}]  }
   0x1   :  { %12 = vsyncpa [#allocation4], 0 }
   0x2   :  { %13 = vsyncpa [#allocation7], 0  ;;  %s1340_s18 = smov [#allocation2]  }
   0x3   :  { %s25_s19 = sshll.u32 %s1340_s18, 4  ;;  %s26_s19 = int_to_ptr.vmem [resolvable:$true] %s25_s19 }
   0x4   :  { %s1282_s20 = scalar_lea.vmem %s26_s19, 12800  ;;  %p1287_p1 = scmp.lt.s32.totalorder %s26_s19, %s26_s19 }
   0x5   :  { %p1283_p0 = scmp.ne.s32.totalorder %s26_s19, %s1282_s20  ;;  %p1288_p2 = scmp.lt.s32.totalorder %s1282_s20, %s1282_s20 }
   0x7   :  { %p1289_p3 = por %p1288_p2, %p1287_p1 }
   0x9   :  { %p1290_p4 = pnand %p1289_p3, %p1283_p0 }
   0xb   :  { %1293 = shalt.err (!%p1290_p4)
}
   0xc   :  { %s1341_s21 = smov 256   ;;  %s1342_s22 = smov 16  }
   0xd   :  { %31 = dma.hbm_to_vmem [thread:$0]  %s3550_s3, 12800, %s26_s19, [#allocation3], %s1341_s21, %s1341_s21, %s1342_s22  }
   0xe   :  { %1334 = dma.done.wait [#allocation3], 12800  }
   0xf   :  { %1335 = vsyncadd [#allocation3], 4294954496  ;;  %v35_v0 = vld [vmem:[%s3547_s0] sm:$0xff]  ;;  %v36_v5 = vld [vmem:[%s3547_s0 + $0x8] sm:$0xff]  ;;  %vm636_vm0 = vcmask 588800  }
  0x10   :  { %v85_v1 = vld [vmem:[%s3548_s1] sm:$0xff]  ;;  %v86_v6 = vld [vmem:[%s3548_s1 + $0x8] sm:$0xff]  ;;  %v37_v11 = vld [vmem:[%s3547_s0 + $0x10] sm:$0xff] }
  0x11   :  { %v135_v2 = vld [vmem:[%s3549_s2] sm:$0xff]  ;;  %v136_v9 = vld [vmem:[%s3549_s2 + $0x8] sm:$0xff]  ;;  %v87_v15 = vld [vmem:[%s3548_s1 + $0x10] sm:$0xff] }
  0x12   :  { %v235_v3 = vld [vmem:[#allocation2] sm:$0xff]  ;;  %v335_v4 = vmul.f32 %v135_v2, %v35_v0  ;;  %v736_v7 = vmul.f32 %v135_v2, %v85_v1  ;;  %v236_v10 = vld [vmem:[#allocation2 + $0x8] sm:$0xff]  ;;  %v336_v13 = vmul.f32 %v136_v9, %v36_v5  ;;  %v137_v16 = vld [vmem:[%s3549_s2 + $0x10] sm:$0xff]  ;;  %v737_v18 = vmul.f32 %v136_v9, %v86_v6 }
  0x13   :  { %v435_v8 = vmul.f32 %v235_v3, %v85_v1  ;;  %v836_v12 = vmul.f32 %v235_v3, %v35_v0  ;;  %v436_v14 = vmul.f32 %v236_v10, %v86_v6  ;;  %v237_v17 = vld [vmem:[#allocation2 + $0x10] sm:$0xff]  ;;  %v837_v19 = vmul.f32 %v236_v10, %v36_v5  ;;  %v38_v23 = vld [vmem:[%s3547_s0 + $0x18] sm:$0xff]  ;;  %v39_v30 = vld [vmem:[%s3547_s0 + $0x20] sm:$0xff] }
  0x14   :  { %v337_v21 = vmul.f32 %v137_v16, %v37_v11  ;;  %v437_v22 = vmul.f32 %v237_v17, %v87_v15  ;;  %v88_v24 = vld [vmem:[%s3548_s1 + $0x18] sm:$0xff]  ;;  %v89_v31 = vld [vmem:[%s3548_s1 + $0x20] sm:$0xff]  ;;  %v738_v33 = vmul.f32 %v137_v16, %v87_v15  ;;  %v40_v38 = vld [vmem:[%s3547_s0 + $0x28] sm:$0xff]  ;;  %v838_v39 = vmul.f32 %v237_v17, %v37_v11 }
  0x15   :  { %v535_v20 = vsub.f32 %v335_v4, %v435_v8  ;;  %v138_v25 = vld [vmem:[%s3549_s2 + $0x18] sm:$0xff]  ;;  %v936_v26 = vadd.f32 %v836_v12, %v736_v7  ;;  %v536_v27 = vsub.f32 %v336_v13, %v436_v14  ;;  %v937_v32 = vadd.f32 %v837_v19, %v737_v18  ;;  %v139_v36 = vld [vmem:[%s3549_s2 + $0x20] sm:$0xff]  ;;  %v90_v43 = vld [vmem:[%s3548_s1 + $0x28] sm:$0xff] }
  0x16   :  { %v238_v28 = vld [vmem:[#allocation2 + $0x18] sm:$0xff]  ;;  %v338_v29 = vmul.f32 %v138_v25, %v38_v23  ;;  %v537_v34 = vsub.f32 %v337_v21, %v437_v22  ;;  %v239_v37 = vld [vmem:[#allocation2 + $0x20] sm:$0xff]  ;;  %v739_v40 = vmul.f32 %v138_v25, %v88_v24  ;;  %v339_v41 = vmul.f32 %v139_v36, %v39_v30  ;;  %v140_v44 = vld [vmem:[%s3549_s2 + $0x28] sm:$0xff] }
  0x17   :  { %635 = vst [vmem:[#allocation5] sm:$0xff] %v535_v20  ;;  %v438_v35 = vmul.f32 %v238_v28, %v88_v24  ;;  %1036 = vst [vmem:[#allocation6] sm:$0xff] %v936_v26  ;;  %v439_v42 = vmul.f32 %v239_v37, %v89_v31  ;;  %v240_v45 = vld [vmem:[#allocation2 + $0x28] sm:$0xff]  ;;  %v839_v46 = vmul.f32 %v238_v28, %v38_v23  ;;  %v41_v51 = vld [vmem:[%s3547_s0 + $0x30] sm:$0xff] }
  0x18   :  { %637 = vst.msk [vmem:[#allocation5 + $0x8] sm:$0xff] %vm636_vm0, %v536_v27  ;;  %1037 = vst.msk [vmem:[#allocation6 + $0x8] sm:$0xff] %vm636_vm0, %v937_v32  ;;  %v740_v47 = vmul.f32 %v139_v36, %v89_v31  ;;  %v340_v49 = vmul.f32 %v140_v44, %v40_v38  ;;  %v440_v50 = vmul.f32 %v240_v45, %v90_v43  ;;  %v91_v52 = vld [vmem:[%s3548_s1 + $0x30] sm:$0xff]  ;;  %v42_v58 = vld [vmem:[%s3547_s0 + $0x38] sm:$0xff] }
  0x19   :  { %638 = vst [vmem:[#allocation5 + $0x10] sm:$0xff] %v537_v34  ;;  %v538_v48 = vsub.f32 %v338_v29, %v438_v35  ;;  %v141_v53 = vld [vmem:[%s3549_s2 + $0x30] sm:$0xff]  ;;  %v938_v54 = vadd.f32 %v838_v39, %v738_v33  ;;  %v539_v55 = vsub.f32 %v339_v41, %v439_v42  ;;  %v92_v59 = vld [vmem:[%s3548_s1 + $0x38] sm:$0xff]  ;;  %v939_v60 = vadd.f32 %v839_v46, %v739_v40  ;;  %v43_v2 = vld [vmem:[%s3547_s0 + $0x40] sm:$0xff] }
  0x1a   :  { %v241_v56 = vld [vmem:[#allocation2 + $0x30] sm:$0xff]  ;;  %v341_v57 = vmul.f32 %v141_v53, %v41_v51  ;;  %v840_v61 = vmul.f32 %v239_v37, %v39_v30  ;;  %v540_v62 = vsub.f32 %v340_v49, %v440_v50  ;;  %v142_v0 = vld [vmem:[%s3549_s2 + $0x38] sm:$0xff]  ;;  %v741_v3 = vmul.f32 %v140_v44, %v90_v43  ;;  %v93_v7 = vld [vmem:[%s3548_s1 + $0x40] sm:$0xff] }
  0x1b   :  { %639 = vst.msk [vmem:[#allocation5 + $0x18] sm:$0xff] %vm636_vm0, %v538_v48  ;;  %v441_v63 = vmul.f32 %v241_v56, %v91_v52  ;;  %v242_v1 = vld [vmem:[#allocation2 + $0x38] sm:$0xff]  ;;  %1038 = vst [vmem:[#allocation6 + $0x10] sm:$0xff] %v938_v54  ;;  %v841_v4 = vmul.f32 %v240_v45, %v40_v38  ;;  %v342_v5 = vmul.f32 %v142_v0, %v42_v58  ;;  %v143_v8 = vld [vmem:[%s3549_s2 + $0x40] sm:$0xff] }
  0x1c   :  { %640 = vst [vmem:[#allocation5 + $0x20] sm:$0xff] %v539_v55  ;;  %v442_v6 = vmul.f32 %v242_v1, %v92_v59  ;;  %v243_v9 = vld [vmem:[#allocation2 + $0x40] sm:$0xff]  ;;  %1039 = vst.msk [vmem:[#allocation6 + $0x18] sm:$0xff] %vm636_vm0, %v939_v60  ;;  %v940_v10 = vadd.f32 %v840_v61, %v740_v47  ;;  %v742_v11 = vmul.f32 %v141_v53, %v91_v52  ;;  %v44_v15 = vld [vmem:[%s3547_s0 + $0x48] sm:$0xff] }
  0x1d   :  { %641 = vst.msk [vmem:[#allocation5 + $0x28] sm:$0xff] %vm636_vm0, %v540_v62  ;;  %v541_v12 = vsub.f32 %v341_v57, %v441_v63  ;;  %v343_v13 = vmul.f32 %v143_v8, %v43_v2  ;;  %v443_v14 = vmul.f32 %v243_v9, %v93_v7  ;;  %v94_v16 = vld [vmem:[%s3548_s1 + $0x48] sm:$0xff]  ;;  %v941_v18 = vadd.f32 %v841_v4, %v741_v3  ;;  %v45_v22 = vld [vmem:[%s3547_s0 + $0x50] sm:$0xff]  ;;  %v1488_v30 = vld [vmem:[%s3547_s0 + $0x58] sm:$0xff] }
  0x1e   :  { %v144_v17 = vld [vmem:[%s3549_s2 + $0x48] sm:$0xff]  ;;  %v542_v19 = vsub.f32 %v342_v5, %v442_v6  ;;  %v95_v23 = vld [vmem:[%s3548_s1 + $0x50] sm:$0xff]  ;;  %1040 = vst [vmem:[#allocation6 + $0x20] sm:$0xff] %v940_v10  ;;  %v842_v24 = vmul.f32 %v241_v56, %v41_v51  ;;  %v743_v25 = vmul.f32 %v142_v0, %v92_v59  ;;  %v843_v31 = vmul.f32 %v242_v1, %v42_v58  ;;  %v1495_v35 = vld [vmem:[%s3548_s1 + $0x58] sm:$0xff] }
  0x1f   :  { %v244_v20 = vld [vmem:[#allocation2 + $0x48] sm:$0xff]  ;;  %v344_v21 = vmul.f32 %v144_v17, %v44_v15  ;;  %642 = vst [vmem:[#allocation5 + $0x30] sm:$0xff] %v541_v12  ;;  %v543_v26 = vsub.f32 %v343_v13, %v443_v14  ;;  %v145_v28 = vld [vmem:[%s3549_s2 + $0x50] sm:$0xff]  ;;  %1041 = vst.msk [vmem:[#allocation6 + $0x28] sm:$0xff] %vm636_vm0, %v941_v18  ;;  %v744_v32 = vmul.f32 %v143_v8, %v93_v7 }
  0x20   :  { %v444_v27 = vmul.f32 %v244_v20, %v94_v16  ;;  %v245_v29 = vld [vmem:[#allocation2 + $0x50] sm:$0xff]  ;;  %643 = vst.msk [vmem:[#allocation5 + $0x38] sm:$0xff] %vm636_vm0, %v542_v19  ;;  %v345_v33 = vmul.f32 %v145_v28, %v45_v22  ;;  %v146_v36 = vld [vmem:[%s3549_s2 + $0x58] sm:$0xff]  ;;  %v942_v38 = vadd.f32 %v842_v24, %v742_v11  ;;  %v844_v39 = vmul.f32 %v243_v9, %v43_v2  ;;  %v1505_v43 = vld [vmem:[%s3547_s0 + $0x60] sm:$0xff] }
  0x21   :  { %v445_v34 = vmul.f32 %v245_v29, %v95_v23  ;;  %v246_v37 = vld [vmem:[#allocation2 + $0x58] sm:$0xff]  ;;  %644 = vst [vmem:[#allocation5 + $0x40] sm:$0xff] %v543_v26  ;;  %v346_v41 = vmul.f32 %v146_v36, %v1488_v30  ;;  %v1510_v44 = vld [vmem:[%s3548_s1 + $0x60] sm:$0xff]  ;;  %v943_v46 = vadd.f32 %v843_v31, %v743_v25  ;;  %v1519_v50 = vld [vmem:[%s3547_s0 + $0x68] sm:$0xff]  ;;  %v745_v53 = vmul.f32 %v144_v17, %v94_v16 }
  0x22   :  { %v544_v40 = vsub.f32 %v344_v21, %v444_v27  ;;  %v446_v42 = vmul.f32 %v246_v37, %v1495_v35  ;;  %v147_v45 = vld [vmem:[%s3549_s2 + $0x60] sm:$0xff]  ;;  %v1524_v51 = vld [vmem:[%s3548_s1 + $0x68] sm:$0xff]  ;;  %1042 = vst [vmem:[#allocation6 + $0x30] sm:$0xff] %v942_v38  ;;  %v944_v52 = vadd.f32 %v844_v39, %v744_v32  ;;  %v1534_v58 = vld [vmem:[%s3547_s0 + $0x70] sm:$0xff]  ;;  %v845_v59 = vmul.f32 %v244_v20, %v44_v15 }
  0x23   :  { %v545_v47 = vsub.f32 %v345_v33, %v445_v34  ;;  %v247_v48 = vld [vmem:[#allocation2 + $0x60] sm:$0xff]  ;;  %v347_v49 = vmul.f32 %v147_v45, %v1505_v43  ;;  %v148_v56 = vld [vmem:[%s3549_s2 + $0x68] sm:$0xff]  ;;  %1043 = vst.msk [vmem:[#allocation6 + $0x38] sm:$0xff] %vm636_vm0, %v943_v46  ;;  %v746_v60 = vmul.f32 %v145_v28, %v95_v23  ;;  %v1542_v63 = vld [vmem:[%s3548_s1 + $0x70] sm:$0xff]  ;;  %v846_v2 = vmul.f32 %v245_v29, %v45_v22 }
  0x24   :  { %645 = vst.msk [vmem:[#allocation5 + $0x48] sm:$0xff] %vm636_vm0, %v544_v40  ;;  %v546_v54 = vsub.f32 %v346_v41, %v446_v42  ;;  %v447_v55 = vmul.f32 %v247_v48, %v1510_v44  ;;  %v248_v57 = vld [vmem:[#allocation2 + $0x68] sm:$0xff]  ;;  %v348_v61 = vmul.f32 %v148_v56, %v1519_v50  ;;  %v149_v0 = vld [vmem:[%s3549_s2 + $0x70] sm:$0xff]  ;;  %1044 = vst [vmem:[#allocation6 + $0x40] sm:$0xff] %v944_v52 }
  0x25   :  { %646 = vst [vmem:[#allocation5 + $0x50] sm:$0xff] %v545_v47  ;;  %v448_v62 = vmul.f32 %v248_v57, %v1524_v51  ;;  %v249_v1 = vld [vmem:[#allocation2 + $0x70] sm:$0xff]  ;;  %v747_v3 = vmul.f32 %v146_v36, %v1495_v35  ;;  %v349_v5 = vmul.f32 %v149_v0, %v1534_v58  ;;  %v1554_v7 = vld [vmem:[%s3547_s0 + $0x78] sm:$0xff]  ;;  %v945_v10 = vadd.f32 %v845_v59, %v745_v53  ;;  %v1568_v14 = vld [vmem:[%s3547_s0 + $0x80] sm:$0xff] }
  0x26   :  { %647 = vst.msk [vmem:[#allocation5 + $0x58] sm:$0xff] %vm636_vm0, %v546_v54  ;;  %v547_v4 = vsub.f32 %v347_v49, %v447_v55  ;;  %v449_v6 = vmul.f32 %v249_v1, %v1542_v63  ;;  %3716 = vst [vmem:[#allocation11_spill] sm:$0xff] %v1554_v7  ;;  %v1559_v8 = vld [vmem:[%s3548_s1 + $0x78] sm:$0xff]  ;;  %v1573_v15 = vld [vmem:[%s3548_s1 + $0x80] sm:$0xff]  ;;  %v946_v16 = vadd.f32 %v846_v2, %v746_v60 }
  0x27   :  { %3717 = vst [vmem:[#allocation12_spill] sm:$0xff] %v1559_v8  ;;  %v150_v9 = vld [vmem:[%s3549_s2 + $0x78] sm:$0xff]  ;;  %v548_v11 = vsub.f32 %v348_v61, %v448_v62  ;;  %3718 = vst [vmem:[#allocation13_spill] sm:$0xff] %v1568_v14  ;;  %v847_v17 = vmul.f32 %v246_v37, %v1488_v30  ;;  %v1580_v20 = vld [vmem:[%s3549_s2 + $0x80] sm:$0xff]  ;;  %v748_v23 = vmul.f32 %v147_v45, %v1510_v44 }
  0x28   :  { %v250_v12 = vld [vmem:[#allocation2 + $0x78] sm:$0xff]  ;;  %v350_v13 = vmul.f32 %v150_v9, %v1554_v7  ;;  %3719 = vst [vmem:[#allocation14_spill] sm:$0xff] %v1573_v15  ;;  %648 = vst [vmem:[#allocation5 + $0x60] sm:$0xff] %v547_v4  ;;  %v549_v18 = vsub.f32 %v349_v5, %v449_v6  ;;  %v1582_v21 = vld [vmem:[#allocation2 + $0x80] sm:$0xff]  ;;  %v848_v24 = vmul.f32 %v247_v48, %v1505_v43 }
  0x29   :  { %v450_v19 = vmul.f32 %v250_v12, %v1559_v8  ;;  %v1587_v22 = vld [vmem:[%s3547_s0 + $0x88] sm:$0xff]  ;;  %1045 = vst.msk [vmem:[#allocation6 + $0x48] sm:$0xff] %vm636_vm0, %v945_v10  ;;  %649 = vst.msk [vmem:[#allocation5 + $0x68] sm:$0xff] %vm636_vm0, %v548_v11  ;;  %v351_v25 = vmul.f32 %v1580_v20, %v1568_v14  ;;  %v451_v26 = vmul.f32 %v1582_v21, %v1573_v15  ;;  %v1614_v37 = vld [vmem:[%s3547_s0 + $0x90] sm:$0xff] }
  0x2a   :  { %3720 = vst [vmem:[#allocation15_spill] sm:$0xff] %v1587_v22  ;;  %v1600_v27 = vld [vmem:[%s3548_s1 + $0x88] sm:$0xff]  ;;  %1046 = vst [vmem:[#allocation6 + $0x50] sm:$0xff] %v946_v16  ;;  %v947_v31 = vadd.f32 %v847_v17, %v747_v3  ;;  %v749_v32 = vmul.f32 %v148_v56, %v1524_v51  ;;  %v1619_v38 = vld [vmem:[%s3548_s1 + $0x90] sm:$0xff]  ;;  %v948_v40 = vadd.f32 %v848_v24, %v748_v23 }
  0x2b   :  { %3721 = vst [vmem:[#allocation16_spill] sm:$0xff] %v1600_v27  ;;  %v152_v28 = vld [vmem:[%s3549_s2 + $0x88] sm:$0xff]  ;;  %650 = vst [vmem:[#allocation5 + $0x70] sm:$0xff] %v549_v18  ;;  %v550_v33 = vsub.f32 %v350_v13, %v450_v19  ;;  %v153_v39 = vld [vmem:[%s3549_s2 + $0x90] sm:$0xff]  ;;  %v551_v41 = vsub.f32 %v351_v25, %v451_v26  ;;  %v849_v48 = vmul.f32 %v248_v57, %v1519_v50 }
  0x2c   :  { %v1605_v29 = vld [vmem:[#allocation2 + $0x88] sm:$0xff]  ;;  %v352_v34 = vmul.f32 %v152_v28, %v1587_v22  ;;  %3722 = vst [vmem:[#allocation17_spill] sm:$0xff] %v1614_v37  ;;  %3723 = vst [vmem:[#allocation18_spill] sm:$0xff] %v1619_v38  ;;  %v1624_v42 = vld [vmem:[#allocation2 + $0x90] sm:$0xff]  ;;  %v353_v45 = vmul.f32 %v153_v39, %v1614_v37  ;;  %v750_v49 = vmul.f32 %v149_v0, %v1542_v63 }
  0x2d   :  { %v452_v36 = vmul.f32 %v1605_v29, %v1600_v27  ;;  %v1630_v46 = vld [vmem:[%s3547_s0 + $0x98] sm:$0xff]  ;;  %1047 = vst.msk [vmem:[#allocation6 + $0x58] sm:$0xff] %vm636_vm0, %v947_v31  ;;  %651 = vst.msk [vmem:[#allocation5 + $0x78] sm:$0xff] %vm636_vm0, %v550_v33  ;;  %v453_v53 = vmul.f32 %v1624_v42, %v1619_v38  ;;  %v1653_v56 = vld [vmem:[%s3547_s0 + $0xa0] sm:$0xff]  ;;  %v850_v57 = vmul.f32 %v249_v1, %v1534_v58 }
  0x2e   :  { %3724 = vst [vmem:[#allocation19_spill] sm:$0xff] %v1630_v46  ;;  %v1635_v47 = vld [vmem:[%s3548_s1 + $0x98] sm:$0xff]  ;;  %3726 = vst [vmem:[#allocation21_spill] sm:$0xff] %v1653_v56  ;;  %v751_v59 = vmul.f32 %v150_v9, %v1559_v8  ;;  %v1664_v62 = vld [vmem:[%s3548_s1 + $0xa0] sm:$0xff]  ;;  %v949_v2 = vadd.f32 %v849_v48, %v749_v32  ;;  %v851_v3 = vmul.f32 %v250_v12, %v1554_v7 }
  0x2f   :  { %3725 = vst [vmem:[#allocation20_spill] sm:$0xff] %v1635_v47  ;;  %v552_v52 = vsub.f32 %v352_v34, %v452_v36  ;;  %v1646_v54 = vld [vmem:[%s3549_s2 + $0x98] sm:$0xff]  ;;  %1048 = vst [vmem:[#allocation6 + $0x60] sm:$0xff] %v948_v40  ;;  %v1669_v0 = vld [vmem:[%s3549_s2 + $0xa0] sm:$0xff]  ;;  %v553_v4 = vsub.f32 %v353_v45, %v453_v53  ;;  %v950_v12 = vadd.f32 %v850_v57, %v750_v49 }
  0x30   :  { %v1648_v55 = vld [vmem:[#allocation2 + $0x98] sm:$0xff]  ;;  %652 = vst [vmem:[#allocation5 + $0x80] sm:$0xff] %v551_v41  ;;  %v354_v60 = vmul.f32 %v1646_v54, %v1630_v46  ;;  %3727 = vst [vmem:[#allocation22_spill] sm:$0xff] %v1664_v62  ;;  %v1671_v1 = vld [vmem:[#allocation2 + $0xa0] sm:$0xff]  ;;  %v355_v5 = vmul.f32 %v1669_v0, %v1653_v56  ;;  %v951_v23 = vadd.f32 %v851_v3, %v751_v59 }
  0x31   :  { %v454_v61 = vmul.f32 %v1648_v55, %v1635_v47  ;;  %653 = vst.msk [vmem:[#allocation5 + $0x88] sm:$0xff] %vm636_vm0, %v552_v52  ;;  %v455_v6 = vmul.f32 %v1671_v1, %v1664_v62  ;;  %v1682_v9 = vld [vmem:[%s3547_s0 + $0xa8] sm:$0xff]  ;;  %v1701_v18 = vld [vmem:[%s3547_s0 + $0xb0] sm:$0xff]  ;;  %1049 = vst.msk [vmem:[#allocation6 + $0x68] sm:$0xff] %vm636_vm0, %v949_v2  ;;  %v752_v24 = vmul.f32 %v1580_v20, %v1573_v15 }
  0x32   :  { %3728 = vst [vmem:[#allocation23_spill] sm:$0xff] %v1682_v9  ;;  %v1687_v10 = vld [vmem:[%s3548_s1 + $0xa8] sm:$0xff]  ;;  %3730 = vst [vmem:[#allocation25_spill] sm:$0xff] %v1701_v18  ;;  %v1706_v19 = vld [vmem:[%s3548_s1 + $0xb0] sm:$0xff]  ;;  %v852_v20 = vmul.f32 %v1582_v21, %v1568_v14  ;;  %v753_v34 = vmul.f32 %v152_v28, %v1600_v27  ;;  %v853_v28 = vmul.f32 %v1605_v29, %v1587_v22 }
  0x33   :  { %3729 = vst [vmem:[#allocation24_spill] sm:$0xff] %v1687_v10  ;;  %v1692_v11 = vld [vmem:[%s3549_s2 + $0xa8] sm:$0xff]  ;;  %v554_v13 = vsub.f32 %v354_v60, %v454_v61  ;;  %3731 = vst [vmem:[#allocation26_spill] sm:$0xff] %v1706_v19  ;;  %v555_v25 = vsub.f32 %v355_v5, %v455_v6  ;;  %v1716_v31 = vld [vmem:[%s3549_s2 + $0xb0] sm:$0xff]  ;;  %v754_v48 = vmul.f32 %v153_v39, %v1619_v38 }
  0x34   :  { %v1694_v16 = vld [vmem:[#allocation2 + $0xa8] sm:$0xff]  ;;  %v356_v17 = vmul.f32 %v1692_v11, %v1682_v9  ;;  %654 = vst [vmem:[#allocation5 + $0x90] sm:$0xff] %v553_v4  ;;  %v1718_v32 = vld [vmem:[#allocation2 + $0xb0] sm:$0xff]  ;;  %v1723_v33 = vld [vmem:[%s3547_s0 + $0xb8] sm:$0xff]  ;;  %v357_v36 = vmul.f32 %v1716_v31, %v1701_v18  ;;  %v952_v39 = vadd.f32 %v852_v20, %v752_v24  ;;  %v953_v5 = vadd.f32 %v853_v28, %v753_v34 }
  0x35   :  { %v456_v26 = vmul.f32 %v1694_v16, %v1687_v10  ;;  %3732 = vst [vmem:[#allocation27_spill] sm:$0xff] %v1723_v33  ;;  %1050 = vst [vmem:[#allocation6 + $0x70] sm:$0xff] %v950_v12  ;;  %v457_v40 = vmul.f32 %v1718_v32, %v1706_v19  ;;  %v1736_v41 = vld [vmem:[%s3548_s1 + $0xb8] sm:$0xff]  ;;  %v1756_v57 = vld [vmem:[%s3547_s0 + $0xc0] sm:$0xff]  ;;  %v854_v6 = vmul.f32 %v1624_v42, %v1614_v37 }
  0x36   :  { %655 = vst.msk [vmem:[#allocation5 + $0x98] sm:$0xff] %vm636_vm0, %v554_v13  ;;  %3733 = vst [vmem:[#allocation28_spill] sm:$0xff] %v1736_v41  ;;  %v1741_v45 = vld [vmem:[%s3549_s2 + $0xb8] sm:$0xff]  ;;  %v1761_v59 = vld [vmem:[%s3548_s1 + $0xc0] sm:$0xff]  ;;  %v755_v42 = vmul.f32 %v1646_v54, %v1635_v47 }
  0x37   :  { %v1743_v21 = vld [vmem:[#allocation2 + $0xb8] sm:$0xff]  ;;  %1051 = vst.msk [vmem:[#allocation6 + $0x78] sm:$0xff] %vm636_vm0, %v951_v23  ;;  %656 = vst [vmem:[#allocation5 + $0xa0] sm:$0xff] %v555_v25  ;;  %v556_v49 = vsub.f32 %v356_v17, %v456_v26  ;;  %v358_v52 = vmul.f32 %v1741_v45, %v1723_v33  ;;  %v1766_v29 = vld [vmem:[%s3549_s2 + $0xc0] sm:$0xff]  ;;  %v557_v60 = vsub.f32 %v357_v36, %v457_v40 }
  0x38   :  { %v458_v53 = vmul.f32 %v1743_v21, %v1736_v41  ;;  %3734 = vst [vmem:[#allocation29_spill] sm:$0xff] %v1756_v57  ;;  %3735 = vst [vmem:[#allocation30_spill] sm:$0xff] %v1761_v59  ;;  %v1768_v61 = vld [vmem:[#allocation2 + $0xc0] sm:$0xff]  ;;  %v359_v2 = vmul.f32 %v1766_v29, %v1756_v57  ;;  %v1775_v3 = vld [vmem:[%s3547_s0 + $0xc8] sm:$0xff]  ;;  %v855_v25 = vmul.f32 %v1648_v55, %v1630_v46 }
  0x39   :  { %3736 = vst [vmem:[#allocation31_spill] sm:$0xff] %v1775_v3  ;;  %v1780_v4 = vld [vmem:[%s3548_s1 + $0xc8] sm:$0xff]  ;;  %657 = vst.msk [vmem:[#allocation5 + $0xa8] sm:$0xff] %vm636_vm0, %v556_v49  ;;  %v459_v13 = vmul.f32 %v1768_v61, %v1761_v59  ;;  %v1797_v24 = vld [vmem:[%s3547_s0 + $0xd0] sm:$0xff]  ;;  %v954_v55 = vadd.f32 %v854_v6, %v754_v48  ;;  %v756_v40 = vmul.f32 %v1669_v0, %v1664_v62 }
  0x3a   :  { %3737 = vst [vmem:[#allocation32_spill] sm:$0xff] %v1780_v4  ;;  %v558_v12 = vsub.f32 %v358_v52, %v458_v53  ;;  %v1790_v17 = vld [vmem:[%s3549_s2 + $0xc8] sm:$0xff]  ;;  %3738 = vst [vmem:[#allocation33_spill] sm:$0xff] %v1797_v24  ;;  %v1810_v34 = vld [vmem:[%s3548_s1 + $0xd0] sm:$0xff] }
  0x3b   :  { %v1792_v23 = vld [vmem:[#allocation2 + $0xc8] sm:$0xff]  ;;  %1052 = vst [vmem:[#allocation6 + $0x80] sm:$0xff] %v952_v39  ;;  %658 = vst [vmem:[#allocation5 + $0xb0] sm:$0xff] %v557_v60  ;;  %v360_v26 = vmul.f32 %v1790_v17, %v1775_v3  ;;  %v1815_v36 = vld [vmem:[%s3549_s2 + $0xd0] sm:$0xff]  ;;  %v559_v28 = vsub.f32 %v359_v2, %v459_v13  ;;  %v955_v39 = vadd.f32 %v855_v25, %v755_v42 }
  0x3c   :  { %v460_v20 = vmul.f32 %v1792_v23, %v1780_v4  ;;  %3739 = vst [vmem:[#allocation34_spill] sm:$0xff] %v1810_v34  ;;  %v1817_v54 = vld [vmem:[#allocation2 + $0xd0] sm:$0xff]  ;;  %1053 = vst.msk [vmem:[#allocation6 + $0x88] sm:$0xff] %vm636_vm0, %v953_v5  ;;  %v361_v49 = vmul.f32 %v1815_v36, %v1797_v24  ;;  %v1830_v53 = vld [vmem:[%s3547_s0 + $0xd8] sm:$0xff]  ;;  %v856_v13 = vmul.f32 %v1671_v1, %v1653_v56 }
  0x3d   :  { %659 = vst.msk [vmem:[#allocation5 + $0xb8] sm:$0xff] %vm636_vm0, %v558_v12  ;;  %v461_v52 = vmul.f32 %v1817_v54, %v1810_v34  ;;  %3740 = vst [vmem:[#allocation35_spill] sm:$0xff] %v1830_v53  ;;  %v1835_v48 = vld [vmem:[%s3548_s1 + $0xd8] sm:$0xff]  ;;  %v1849_v6 = vld [vmem:[%s3547_s0 + $0xe0] sm:$0xff]  ;;  %v757_v42 = vmul.f32 %v1692_v11, %v1687_v10  ;;  %v857_v1 = vmul.f32 %v1694_v16, %v1682_v9 }
  0x3e   :  { %3741 = vst [vmem:[#allocation36_spill] sm:$0xff] %v1835_v48  ;;  %v1840_v0 = vld [vmem:[%s3549_s2 + $0xd8] sm:$0xff]  ;;  %v560_v60 = vsub.f32 %v360_v26, %v460_v20  ;;  %3742 = vst [vmem:[#allocation37_spill] sm:$0xff] %v1849_v6  ;;  %v1854_v12 = vld [vmem:[%s3548_s1 + $0xe0] sm:$0xff]  ;;  %v758_v11 = vmul.f32 %v1716_v31, %v1706_v19  ;;  %v956_v31 = vadd.f32 %v856_v13, %v756_v40 }
  0x3f   :  { %v1842_v2 = vld [vmem:[#allocation2 + $0xd8] sm:$0xff]  ;;  %v362_v5 = vmul.f32 %v1840_v0, %v1830_v53  ;;  %3743 = vst [vmem:[#allocation38_spill] sm:$0xff] %v1854_v12  ;;  %1054 = vst [vmem:[#allocation6 + $0x90] sm:$0xff] %v954_v55  ;;  %v561_v25 = vsub.f32 %v361_v49, %v461_v52  ;;  %v1865_v20 = vld [vmem:[%s3549_s2 + $0xe0] sm:$0xff] }
  0x40   :  { %660 = vst [vmem:[#allocation5 + $0xc0] sm:$0xff] %v559_v28  ;;  %v462_v26 = vmul.f32 %v1842_v2, %v1835_v48  ;;  %v1867_v62 = vld [vmem:[#allocation2 + $0xe0] sm:$0xff]  ;;  %v1872_v55 = vld [vmem:[%s3547_s0 + $0xe8] sm:$0xff]  ;;  %1055 = vst.msk [vmem:[#allocation6 + $0x98] sm:$0xff] %vm636_vm0, %v955_v39  ;;  %v363_v28 = vmul.f32 %v1865_v20, %v1849_v6 }
  0x41   :  { %3744 = vst [vmem:[#allocation39_spill] sm:$0xff] %v1872_v55  ;;  %661 = vst.msk [vmem:[#allocation5 + $0xc8] sm:$0xff] %vm636_vm0, %v560_v60  ;;  %v463_v49 = vmul.f32 %v1867_v62, %v1854_v12  ;;  %v1887_v52 = vld [vmem:[%s3548_s1 + $0xe8] sm:$0xff]  ;;  %v858_v60 = vmul.f32 %v1718_v32, %v1701_v18  ;;  %v1905_v56 = vld [vmem:[%s3547_s0 + $0xf0] sm:$0xff] }
  0x42   :  { %3745 = vst [vmem:[#allocation40_spill] sm:$0xff] %v1887_v52  ;;  %v1892_v16 = vld [vmem:[%s3549_s2 + $0xe8] sm:$0xff]  ;;  %662 = vst [vmem:[#allocation5 + $0xd0] sm:$0xff] %v561_v25  ;;  %v562_v19 = vsub.f32 %v362_v5, %v462_v26  ;;  %v1910_v40 = vld [vmem:[%s3548_s1 + $0xf0] sm:$0xff]  ;;  %v957_v5 = vadd.f32 %v857_v1, %v757_v42  ;;  %v759_v42 = vmul.f32 %v1741_v45, %v1736_v41 }
  0x43   :  { %v1894_v39 = vld [vmem:[#allocation2 + $0xe8] sm:$0xff]  ;;  %v364_v10 = vmul.f32 %v1892_v16, %v1872_v55  ;;  %v1915_v32 = vld [vmem:[%s3549_s2 + $0xf0] sm:$0xff]  ;;  %v563_v13 = vsub.f32 %v363_v28, %v463_v49  ;;  %v1924_v18 = vld [vmem:[%s3547_s0 + $0xf8] sm:$0xff]  ;;  %1056 = vst [vmem:[#allocation6 + $0xa0] sm:$0xff] %v956_v31  ;;  %v958_v46 = vadd.f32 %v858_v60, %v758_v11 }
  0x44   :  { %v464_v9 = vmul.f32 %v1894_v39, %v1887_v52  ;;  %v1917_v25 = vld [vmem:[#allocation2 + $0xf0] sm:$0xff]  ;;  %v365_v26 = vmul.f32 %v1915_v32, %v1905_v56  ;;  %v1929_v47 = vld [vmem:[%s3548_s1 + $0xf8] sm:$0xff]  ;;  %663 = vst.msk [vmem:[#allocation5 + $0xd8] sm:$0xff] %vm636_vm0, %v562_v19  ;;  %v1946_v11 = vld [vmem:[%s3547_s0 + $0x100] sm:$0xff] }
  0x45   :  { %v465_v28 = vmul.f32 %v1917_v25, %v1910_v40  ;;  %v1939_v49 = vld [vmem:[%s3549_s2 + $0xf8] sm:$0xff]  ;;  %1057 = vst.msk [vmem:[#allocation6 + $0xa8] sm:$0xff] %vm636_vm0, %v957_v5  ;;  %664 = vst [vmem:[#allocation5 + $0xe0] sm:$0xff] %v563_v13  ;;  %v1960_v31 = vld [vmem:[%s3548_s1 + $0x100] sm:$0xff]  ;;  %v761_v5 = vmul.f32 %v1790_v17, %v1780_v4 }
  0x46   :  { %v564_v1 = vsub.f32 %v364_v10, %v464_v9  ;;  %v1941_v38 = vld [vmem:[#allocation2 + $0xf8] sm:$0xff]  ;;  %v859_v9 = vmul.f32 %v1743_v21, %v1723_v33  ;;  %v760_v10 = vmul.f32 %v1766_v29, %v1761_v59  ;;  %v366_v19 = vmul.f32 %v1939_v49, %v1924_v18  ;;  %v1965_v60 = vld [vmem:[%s3549_s2 + $0x100] sm:$0xff]  ;;  %1058 = vst [vmem:[#allocation6 + $0xb0] sm:$0xff] %v958_v46  ;;  %v1981_v33 = vld [vmem:[%s3547_s0 + $0x108] sm:$0xff] }
  0x47   :  { %v466_v45 = vmul.f32 %v1941_v38, %v1929_v47  ;;  %v1967_v21 = vld [vmem:[#allocation2 + $0x100] sm:$0xff]  ;;  %v860_v29 = vmul.f32 %v1768_v61, %v1756_v57  ;;  %v565_v13 = vsub.f32 %v365_v26, %v465_v28  ;;  %v367_v59 = vmul.f32 %v1965_v60, %v1946_v11  ;;  %v1986_v46 = vld [vmem:[%s3548_s1 + $0x108] sm:$0xff]  ;;  %v2000_v4 = vld [vmem:[%s3547_s0 + $0x110] sm:$0xff] }
  0x48   :  { %665 = vst.msk [vmem:[#allocation5 + $0xe8] sm:$0xff] %vm636_vm0, %v564_v1  ;;  %v467_v41 = vmul.f32 %v1967_v21, %v1960_v31  ;;  %v1991_v61 = vld [vmem:[%s3549_s2 + $0x108] sm:$0xff]  ;;  %v959_v17 = vadd.f32 %v859_v9, %v759_v42  ;;  %v2005_v57 = vld [vmem:[%s3548_s1 + $0x110] sm:$0xff]  ;;  %v861_v42 = vmul.f32 %v1792_v23, %v1775_v3  ;;  %v2021_v22 = vld [vmem:[%s3547_s0 + $0x118] sm:$0xff] }
  0x49   :  { %v566_v26 = vsub.f32 %v366_v19, %v466_v45  ;;  %v1993_v1 = vld [vmem:[#allocation2 + $0x108] sm:$0xff]  ;;  %v368_v28 = vmul.f32 %v1991_v61, %v1981_v33  ;;  %v960_v37 = vadd.f32 %v860_v29, %v760_v10  ;;  %666 = vst [vmem:[#allocation5 + $0xf0] sm:$0xff] %v565_v13  ;;  %v2014_v45 = vld [vmem:[%s3549_s2 + $0x110] sm:$0xff]  ;;  %v2036_v29 = vld [vmem:[%s3548_s1 + $0x118] sm:$0xff] }
  0x4a   :  { %v567_v9 = vsub.f32 %v367_v59, %v467_v41  ;;  %v468_v19 = vmul.f32 %v1993_v1, %v1986_v46  ;;  %v2016_v27 = vld [vmem:[#allocation2 + $0x110] sm:$0xff]  ;;  %1059 = vst.msk [vmem:[#allocation6 + $0xb8] sm:$0xff] %vm636_vm0, %v959_v17  ;;  %v762_v41 = vmul.f32 %v1815_v36, %v1810_v34  ;;  %v862_v59 = vmul.f32 %v1817_v54, %v1797_v24  ;;  %v2041_v36 = vld [vmem:[%s3549_s2 + $0x118] sm:$0xff]  ;;  %v2054_v3 = vld [vmem:[%s3547_s0 + $0x120] sm:$0xff] }
  0x4b   :  { %667 = vst.msk [vmem:[#allocation5 + $0xf8] sm:$0xff] %vm636_vm0, %v566_v26  ;;  %v369_v23 = vmul.f32 %v2014_v45, %v2000_v4  ;;  %v469_v10 = vmul.f32 %v2016_v27, %v2005_v57  ;;  %v2043_v13 = vld [vmem:[#allocation2 + $0x118] sm:$0xff]  ;;  %1060 = vst [vmem:[#allocation6 + $0xc0] sm:$0xff] %v960_v37  ;;  %v961_v54 = vadd.f32 %v861_v42, %v761_v5  ;;  %v2059_v37 = vld [vmem:[%s3548_s1 + $0x120] sm:$0xff] }
  0x4c   :  { %v763_v17 = vmul.f32 %v1840_v0, %v1835_v48  ;;  %668 = vst [vmem:[#allocation5 + $0x100] sm:$0xff] %v567_v9  ;;  %v568_v26 = vsub.f32 %v368_v28, %v468_v19  ;;  %v370_v34 = vmul.f32 %v2041_v36, %v2021_v22  ;;  %v470_v24 = vmul.f32 %v2043_v13, %v2036_v29  ;;  %v2064_v0 = vld [vmem:[%s3549_s2 + $0x120] sm:$0xff]  ;;  %v2073_v19 = vld [vmem:[%s3547_s0 + $0x128] sm:$0xff] }
  0x4d   :  { %v962_v5 = vadd.f32 %v862_v59, %v762_v41  ;;  %v569_v28 = vsub.f32 %v369_v23, %v469_v10  ;;  %v2066_v42 = vld [vmem:[#allocation2 + $0x120] sm:$0xff]  ;;  %v371_v9 = vmul.f32 %v2064_v0, %v2054_v3  ;;  %v2078_v48 = vld [vmem:[%s3548_s1 + $0x128] sm:$0xff]  ;;  %1061 = vst.msk [vmem:[#allocation6 + $0xc8] sm:$0xff] %vm636_vm0, %v961_v54  ;;  %v863_v41 = vmul.f32 %v1842_v2, %v1830_v53  ;;  %v2098_v2 = vld [vmem:[%s3547_s0 + $0x130] sm:$0xff] }
  0x4e   :  { %v764_v59 = vmul.f32 %v1865_v20, %v1854_v12  ;;  %669 = vst.msk [vmem:[#allocation5 + $0x108] sm:$0xff] %vm636_vm0, %v568_v26  ;;  %v570_v23 = vsub.f32 %v370_v34, %v470_v24  ;;  %v471_v10 = vmul.f32 %v2066_v42, %v2059_v37  ;;  %v2091_v15 = vld [vmem:[%s3549_s2 + $0x128] sm:$0xff]  ;;  %v864_v20 = vmul.f32 %v1867_v62, %v1849_v6  ;;  %v2111_v26 = vld [vmem:[%s3548_s1 + $0x130] sm:$0xff]  ;;  %v2130_v53 = vld [vmem:[%s3547_s0 + $0x138] sm:$0xff] }
  0x4f   :  { %v2093_v14 = vld [vmem:[#allocation2 + $0x128] sm:$0xff]  ;;  %1062 = vst [vmem:[#allocation6 + $0xd0] sm:$0xff] %v962_v5  ;;  %v765_v24 = vmul.f32 %v1892_v16, %v1887_v52  ;;  %670 = vst [vmem:[#allocation5 + $0x110] sm:$0xff] %v569_v28  ;;  %v372_v34 = vmul.f32 %v2091_v15, %v2073_v19  ;;  %v2116_v5 = vld [vmem:[%s3549_s2 + $0x130] sm:$0xff]  ;;  %v963_v16 = vadd.f32 %v863_v41, %v763_v17 }
  0x50   :  { %v472_v54 = vmul.f32 %v2093_v14, %v2078_v48  ;;  %v2118_v62 = vld [vmem:[#allocation2 + $0x130] sm:$0xff]  ;;  %v865_v28 = vmul.f32 %v1894_v39, %v1872_v55  ;;  %671 = vst.msk [vmem:[#allocation5 + $0x118] sm:$0xff] %vm636_vm0, %v570_v23  ;;  %v571_v52 = vsub.f32 %v371_v9, %v471_v10  ;;  %v373_v12 = vmul.f32 %v2116_v5, %v2098_v2  ;;  %v2135_v17 = vld [vmem:[%s3548_s1 + $0x138] sm:$0xff]  ;;  %v2149_v55 = vld [vmem:[%s3547_s0 + $0x140] sm:$0xff] }
  0x51   :  { %v473_v6 = vmul.f32 %v2118_v62, %v2111_v26  ;;  %v2140_v39 = vld [vmem:[%s3549_s2 + $0x138] sm:$0xff]  ;;  %v964_v9 = vadd.f32 %v864_v20, %v764_v59  ;;  %v2154_v8 = vld [vmem:[%s3548_s1 + $0x140] sm:$0xff]  ;;  %1063 = vst.msk [vmem:[#allocation6 + $0xd8] sm:$0xff] %vm636_vm0, %v963_v16  ;;  %v766_v59 = vmul.f32 %v1915_v32, %v1910_v40  ;;  %v2171_v16 = vld [vmem:[%s3547_s0 + $0x148] sm:$0xff] }
  0x52   :  { %3746 = vst [vmem:[#allocation41_spill] sm:$0xff] %v2140_v39  ;;  %v572_v41 = vsub.f32 %v372_v34, %v472_v54  ;;  %v2142_v23 = vld [vmem:[#allocation2 + $0x138] sm:$0xff]  ;;  %v374_v10 = vmul.f32 %v2140_v39, %v2130_v53  ;;  %v965_v7 = vadd.f32 %v865_v28, %v765_v24  ;;  %672 = vst [vmem:[#allocation5 + $0x120] sm:$0xff] %v571_v52  ;;  %v2164_v54 = vld [vmem:[%s3549_s2 + $0x140] sm:$0xff] }
  0x53   :  { %3747 = vst [vmem:[#allocation42_spill] sm:$0xff] %v2142_v23  ;;  %v573_v20 = vsub.f32 %v373_v12, %v473_v6  ;;  %v474_v34 = vmul.f32 %v2142_v23, %v2135_v17  ;;  %3748 = vst [vmem:[#allocation43_spill] sm:$0xff] %v2164_v54  ;;  %v2166_v39 = vld [vmem:[#allocation2 + $0x140] sm:$0xff]  ;;  %v866_v52 = vmul.f32 %v1917_v25, %v1905_v56  ;;  %v2185_v24 = vld [vmem:[%s3548_s1 + $0x148] sm:$0xff] }
  0x54   :  { %3749 = vst [vmem:[#allocation44_spill] sm:$0xff] %v2166_v39  ;;  %1064 = vst [vmem:[#allocation6 + $0xe0] sm:$0xff] %v964_v9  ;;  %v767_v6 = vmul.f32 %v1939_v49, %v1929_v47  ;;  %v375_v12 = vmul.f32 %v2164_v54, %v2149_v55  ;;  %v475_v32 = vmul.f32 %v2166_v39, %v2154_v8  ;;  %v2190_v25 = vld [vmem:[%s3549_s2 + $0x148] sm:$0xff]  ;;  %v2206_v23 = vld [vmem:[%s3547_s0 + $0x150] sm:$0xff] }
  0x55   :  { %673 = vst.msk [vmem:[#allocation5 + $0x128] sm:$0xff] %vm636_vm0, %v572_v41  ;;  %3750 = vst [vmem:[#allocation45_spill] sm:$0xff] %v2185_v24  ;;  %v2192_v28 = vld [vmem:[#allocation2 + $0x148] sm:$0xff]  ;;  %v867_v49 = vmul.f32 %v1941_v38, %v1924_v18  ;;  %v768_v9 = vmul.f32 %v1965_v60, %v1960_v31  ;;  %v574_v41 = vsub.f32 %v374_v10, %v474_v34  ;;  %v2216_v38 = vld [vmem:[%s3549_s2 + $0x150] sm:$0xff] }
  0x56   :  { %3751 = vst [vmem:[#allocation46_spill] sm:$0xff] %v2190_v25  ;;  %3752 = vst [vmem:[#allocation47_spill] sm:$0xff] %v2192_v28  ;;  %v376_v39 = vmul.f32 %v2190_v25, %v2171_v16  ;;  %v476_v54 = vmul.f32 %v2192_v28, %v2185_v24  ;;  %v966_v60 = vadd.f32 %v866_v52, %v766_v59  ;;  %v2225_v28 = vld [vmem:[%s3547_s0 + $0x158] sm:$0xff] }
  0x57   :  { %1065 = vst.msk [vmem:[#allocation6 + $0xe8] sm:$0xff] %vm636_vm0, %v965_v7  ;;  %674 = vst [vmem:[#allocation5 + $0x130] sm:$0xff] %v573_v20  ;;  %v2211_v7 = vld [vmem:[%s3548_s1 + $0x150] sm:$0xff]  ;;  %v575_v10 = vsub.f32 %v375_v12, %v475_v32  ;;  %v377_v34 = vmul.f32 %v2216_v38, %v2206_v23  ;;  %v2230_v25 = vld [vmem:[%s3548_s1 + $0x158] sm:$0xff]  ;;  %v967_v24 = vadd.f32 %v867_v49, %v767_v6 }
  0x58   :  { %3753 = vst [vmem:[#allocation48_spill] sm:$0xff] %v2216_v38  ;;  %v2218_v20 = vld [vmem:[#allocation2 + $0x150] sm:$0xff]  ;;  %3755 = vst [vmem:[#allocation50_spill] sm:$0xff] %v2230_v25  ;;  %v868_v59 = vmul.f32 %v1967_v21, %v1946_v11  ;;  %v576_v52 = vsub.f32 %v376_v39, %v476_v54  ;;  %v2240_v32 = vld [vmem:[%s3549_s2 + $0x158] sm:$0xff]  ;;  %v769_v21 = vmul.f32 %v1991_v61, %v1986_v46 }
  0x59   :  { %3754 = vst [vmem:[#allocation49_spill] sm:$0xff] %v2218_v20  ;;  %675 = vst.msk [vmem:[#allocation5 + $0x138] sm:$0xff] %vm636_vm0, %v574_v41  ;;  %v477_v12 = vmul.f32 %v2218_v20, %v2211_v7  ;;  %v2242_v38 = vld [vmem:[#allocation2 + $0x158] sm:$0xff]  ;;  %v2247_v6 = vld [vmem:[%s3547_s0 + $0x160] sm:$0xff]  ;;  %v869_v39 = vmul.f32 %v1993_v1, %v1981_v33  ;;  %v378_v54 = vmul.f32 %v2240_v32, %v2225_v28 }
  0x5a   :  { %3756 = vst [vmem:[#allocation51_spill] sm:$0xff] %v2240_v32  ;;  %3757 = vst [vmem:[#allocation52_spill] sm:$0xff] %v2242_v38  ;;  %v478_v49 = vmul.f32 %v2242_v38, %v2230_v25  ;;  %v2260_v41 = vld [vmem:[%s3548_s1 + $0x160] sm:$0xff]  ;;  %v968_v1 = vadd.f32 %v868_v59, %v768_v9  ;;  %v2280_v25 = vld [vmem:[%s3547_s0 + $0x168] sm:$0xff] }
  0x5b   :  { %1066 = vst [vmem:[#allocation6 + $0xf0] sm:$0xff] %v966_v60  ;;  %676 = vst [vmem:[#allocation5 + $0x140] sm:$0xff] %v575_v10  ;;  %v2265_v60 = vld [vmem:[%s3549_s2 + $0x160] sm:$0xff]  ;;  %v770_v10 = vmul.f32 %v2014_v45, %v2005_v57  ;;  %v577_v38 = vsub.f32 %v377_v34, %v477_v12  ;;  %v2290_v45 = vld [vmem:[%s3549_s2 + $0x168] sm:$0xff]  ;;  %v969_v9 = vadd.f32 %v869_v39, %v769_v21 }
  0x5c   :  { %3758 = vst [vmem:[#allocation53_spill] sm:$0xff] %v2265_v60  ;;  %v2267_v61 = vld [vmem:[#allocation2 + $0x160] sm:$0xff]  ;;  %1067 = vst.msk [vmem:[#allocation6 + $0xf8] sm:$0xff] %vm636_vm0, %v967_v24  ;;  %v379_v32 = vmul.f32 %v2265_v60, %v2247_v6  ;;  %v2285_v24 = vld [vmem:[%s3548_s1 + $0x168] sm:$0xff]  ;;  %v578_v34 = vsub.f32 %v378_v54, %v478_v49  ;;  %v870_v21 = vmul.f32 %v2016_v27, %v2000_v4 }
  0x5d   :  { %3759 = vst [vmem:[#allocation54_spill] sm:$0xff] %v2267_v61  ;;  %677 = vst.msk [vmem:[#allocation5 + $0x148] sm:$0xff] %vm636_vm0, %v576_v52  ;;  %v479_v20 = vmul.f32 %v2267_v61, %v2260_v41  ;;  %v2292_v59 = vld [vmem:[#allocation2 + $0x168] sm:$0xff]  ;;  %v380_v52 = vmul.f32 %v2290_v45, %v2280_v25  ;;  %v2299_v12 = vld [vmem:[%s3547_s0 + $0x170] sm:$0xff]  ;;  %v771_v39 = vmul.f32 %v2041_v36, %v2036_v29 }
  0x5e   :  { %3760 = vst [vmem:[#allocation55_spill] sm:$0xff] %v2290_v45  ;;  %3761 = vst [vmem:[#allocation56_spill] sm:$0xff] %v2292_v59  ;;  %v2304_v61 = vld [vmem:[%s3548_s1 + $0x170] sm:$0xff]  ;;  %v480_v49 = vmul.f32 %v2292_v59, %v2285_v24  ;;  %v871_v27 = vmul.f32 %v2043_v13, %v2021_v22  ;;  %v772_v36 = vmul.f32 %v2064_v0, %v2059_v37  ;;  %v2342_v13 = vld [vmem:[%s3549_s2 + $0x178] sm:$0xff] }
  0x5f   :  { %3762 = vst [vmem:[#allocation57_spill] sm:$0xff] %v2304_v61  ;;  %1068 = vst [vmem:[#allocation6 + $0x100] sm:$0xff] %v968_v1  ;;  %v579_v54 = vsub.f32 %v379_v32, %v479_v20  ;;  %v2315_v45 = vld [vmem:[%s3549_s2 + $0x170] sm:$0xff]  ;;  %v2322_v1 = vld [vmem:[%s3547_s0 + $0x178] sm:$0xff]  ;;  %v970_v0 = vadd.f32 %v870_v21, %v770_v10 }
  0x60   :  { %678 = vst [vmem:[#allocation5 + $0x150] sm:$0xff] %v577_v38  ;;  %3763 = vst [vmem:[#allocation58_spill] sm:$0xff] %v2315_v45  ;;  %v2317_v60 = vld [vmem:[#allocation2 + $0x170] sm:$0xff]  ;;  %v381_v38 = vmul.f32 %v2315_v45, %v2299_v12  ;;  %v2337_v32 = vld [vmem:[%s3548_s1 + $0x178] sm:$0xff]  ;;  %v580_v45 = vsub.f32 %v380_v52, %v480_v49  ;;  %v971_v52 = vadd.f32 %v871_v27, %v771_v39 }
  0x61   :  { %3764 = vst [vmem:[#allocation59_spill] sm:$0xff] %v2317_v60  ;;  %1069 = vst.msk [vmem:[#allocation6 + $0x108] sm:$0xff] %vm636_vm0, %v969_v9  ;;  %v481_v20 = vmul.f32 %v2317_v60, %v2304_v61  ;;  %v2344_v9 = vld [vmem:[#allocation2 + $0x178] sm:$0xff]  ;;  %v382_v60 = vmul.f32 %v2342_v13, %v2322_v1  ;;  %v2355_v61 = vld [vmem:[%s3547_s0 + $0x180] sm:$0xff]  ;;  %v2383_v39 = vmul.f32 %v2091_v15, %v2078_v48 }
  0x62   :  { %679 = vst.msk [vmem:[#allocation5 + $0x158] sm:$0xff] %vm636_vm0, %v578_v34  ;;  %3765 = vst [vmem:[#allocation60_spill] sm:$0xff] %v2337_v32  ;;  %v872_v34 = vmul.f32 %v2066_v42, %v2054_v3  ;;  %v482_v59 = vmul.f32 %v2344_v9, %v2337_v32  ;;  %v2360_v10 = vld [vmem:[%s3548_s1 + $0x180] sm:$0xff]  ;;  %v2403_v15 = vmul.f32 %v2093_v14, %v2073_v19 }
  0x63   :  { %3766 = vst [vmem:[#allocation61_spill] sm:$0xff] %v2342_v13  ;;  %3767 = vst [vmem:[#allocation62_spill] sm:$0xff] %v2344_v9  ;;  %v2365_v42 = vld [vmem:[%s3549_s2 + $0x180] sm:$0xff]  ;;  %v581_v21 = vsub.f32 %v381_v38, %v481_v20  ;;  %v2374_v9 = vld [vmem:[%s3547_s0 + $0x188] sm:$0xff] }
  0x64   :  { %680 = vst [vmem:[#allocation5 + $0x160] sm:$0xff] %v579_v54  ;;  %3768 = vst [vmem:[#allocation63_spill] sm:$0xff] %v2365_v42  ;;  %v2367_v54 = vld [vmem:[#allocation2 + $0x180] sm:$0xff]  ;;  %v383_v49 = vmul.f32 %v2365_v42, %v2355_v61  ;;  %v2379_v13 = vld [vmem:[%s3548_s1 + $0x188] sm:$0xff]  ;;  %v972_v32 = vadd.f32 %v872_v34, %v772_v36  ;;  %v582_v27 = vsub.f32 %v382_v60, %v482_v59 }
  0x65   :  { %3769 = vst [vmem:[#allocation64_spill] sm:$0xff] %v2367_v54  ;;  %1070 = vst [vmem:[#allocation6 + $0x110] sm:$0xff] %v970_v0  ;;  %v483_v38 = vmul.f32 %v2367_v54, %v2360_v10  ;;  %v2391_v20 = vld [vmem:[%s3549_s2 + $0x188] sm:$0xff]  ;;  %v2398_v36 = vld [vmem:[%s3549_s2 + $0x190] sm:$0xff]  ;;  %v2407_v60 = vmul.f32 %v2116_v5, %v2111_v26 }
  0x66   :  { %3770 = vst [vmem:[#allocation65_spill] sm:$0xff] %v2383_v39  ;;  %681 = vst.msk [vmem:[#allocation5 + $0x168] sm:$0xff] %vm636_vm0, %v580_v45  ;;  %v2393_v42 = vld [vmem:[#allocation2 + $0x188] sm:$0xff]  ;;  %v384_v45 = vmul.f32 %v2391_v20, %v2374_v9  ;;  %v2413_v0 = vld [vmem:[#allocation2 + $0x190] sm:$0xff] }
  0x67   :  { %3771 = vst [vmem:[#allocation66_spill] sm:$0xff] %v2391_v20  ;;  %3772 = vst [vmem:[#allocation67_spill] sm:$0xff] %v2393_v42  ;;  %v484_v59 = vmul.f32 %v2393_v42, %v2379_v13  ;;  %v2418_v34 = vld [vmem:[%s3547_s0] sm:$0xff]  ;;  %v2425_v5 = vld [vmem:[%s3549_s2 + $0x198] sm:$0xff]  ;;  %v583_v42 = vsub.f32 %v383_v49, %v483_v38 }
  0x68   :  { %3773 = vst [vmem:[#allocation68_spill] sm:$0xff] %v2398_v36  ;;  %1071 = vst.msk [vmem:[#allocation6 + $0x118] sm:$0xff] %vm636_vm0, %v971_v52  ;;  %v385_v14 = vmul.f32 %v2418_v34, %v2398_v36  ;;  %v2427_v52 = vld [vmem:[#allocation2 + $0x198] sm:$0xff]  ;;  %v2437_v20 = vld [vmem:[%s3548_s1] sm:$0xff] }
  0x69   :  { %3774 = vst [vmem:[#allocation69_spill] sm:$0xff] %v2403_v15  ;;  %3775 = vst [vmem:[#allocation70_spill] sm:$0xff] %v2407_v60  ;;  %v2444_v36 = vld [vmem:[%s3547_s0 + $0x8] sm:$0xff]  ;;  %v2460_v38 = vld [vmem:[#allocation2 + $0x1a0] sm:$0xff] }
  0x6a   :  { %682 = vst [vmem:[#allocation5 + $0x170] sm:$0xff] %v581_v21  ;;  %3776 = vst [vmem:[#allocation71_spill] sm:$0xff] %v2413_v0  ;;  %v2431_v21 = vmul.f32 %v2118_v62, %v2098_v2  ;;  %v386_v62 = vmul.f32 %v2444_v36, %v2425_v5  ;;  %v2481_v54 = vld [vmem:[#allocation2 + $0x1a8] sm:$0xff]  ;;  %v2602_v39 = vld [vmem:[#allocation2 + $0x1d8] sm:$0xff] }
  0x6b   :  { %3777 = vst [vmem:[#allocation72_spill] sm:$0xff] %v2418_v34  ;;  %3778 = vst [vmem:[#allocation73_spill] sm:$0xff] %v2425_v5  ;;  %v485_v34 = vmul.f32 %v2437_v20, %v2413_v0  ;;  %v2465_v0 = vld [vmem:[%s3549_s2 + $0x1a8] sm:$0xff]  ;;  %v2470_v5 = vld [vmem:[%s3547_s0 + $0x10] sm:$0xff] }
  0x6c   :  { %3779 = vst [vmem:[#allocation74_spill] sm:$0xff] %v2427_v52  ;;  %1072 = vst [vmem:[#allocation6 + $0x120] sm:$0xff] %v972_v32  ;;  %v2451_v32 = vld [vmem:[%s3548_s1 + $0x8] sm:$0xff] }
  0x6d   :  { %3780 = vst [vmem:[#allocation75_spill] sm:$0xff] %v2431_v21  ;;  %683 = vst.msk [vmem:[#allocation5 + $0x178] sm:$0xff] %vm636_vm0, %v582_v27  ;;  %v486_v49 = vmul.f32 %v2451_v32, %v2427_v52  ;;  %v2458_v27 = vld [vmem:[%s3549_s2 + $0x1a0] sm:$0xff]  ;;  %v585_v21 = vsub.f32 %v385_v14, %v485_v34  ;;  %v2516_v34 = vld [vmem:[#allocation2 + $0x1b8] sm:$0xff] }
  0x6e   :  { %3781 = vst [vmem:[#allocation76_spill] sm:$0xff] %v2437_v20  ;;  %3782 = vst [vmem:[#allocation77_spill] sm:$0xff] %v2444_v36  ;;  %v584_v36 = vsub.f32 %v384_v45, %v484_v59  ;;  %v387_v52 = vmul.f32 %v2470_v5, %v2458_v27  ;;  %v2486_v45 = vld [vmem:[%s3547_s0 + $0x18] sm:$0xff]  ;;  %v2521_v14 = vld [vmem:[%s3549_s2 + $0x1c0] sm:$0xff] }
  0x6f   :  { %3783 = vst [vmem:[#allocation78_spill] sm:$0xff] %v2451_v32  ;;  %3784 = vst [vmem:[#allocation79_spill] sm:$0xff] %v2458_v27  ;;  %v2477_v32 = vld [vmem:[%s3548_s1 + $0x10] sm:$0xff]  ;;  %v388_v59 = vmul.f32 %v2486_v45, %v2465_v0 }
  0x70   :  { %3785 = vst [vmem:[#allocation80_spill] sm:$0xff] %v2460_v38  ;;  %3786 = vst [vmem:[#allocation81_spill] sm:$0xff] %v2465_v0  ;;  %v487_v20 = vmul.f32 %v2477_v32, %v2460_v38  ;;  %v2495_v27 = vld [vmem:[#allocation2 + $0x1b0] sm:$0xff]  ;;  %v586_v38 = vsub.f32 %v386_v62, %v486_v49  ;;  %v2527_v49 = vld [vmem:[%s3548_s1 + $0x20] sm:$0xff] }
  0x71   :  { %3787 = vst [vmem:[#allocation82_spill] sm:$0xff] %v2470_v5  ;;  %3788 = vst [vmem:[#allocation83_spill] sm:$0xff] %v2477_v32  ;;  %v2493_v5 = vld [vmem:[%s3549_s2 + $0x1b0] sm:$0xff]  ;;  %v2500_v32 = vld [vmem:[%s3548_s1 + $0x18] sm:$0xff] }
  0x72   :  { %3789 = vst [vmem:[#allocation84_spill] sm:$0xff] %v2481_v54  ;;  %3790 = vst [vmem:[#allocation85_spill] sm:$0xff] %v2486_v45  ;;  %v488_v60 = vmul.f32 %v2500_v32, %v2481_v54  ;;  %v2507_v45 = vld [vmem:[%s3547_s0 + $0x20] sm:$0xff]  ;;  %v587_v62 = vsub.f32 %v387_v52, %v487_v20  ;;  %v2541_v20 = vld [vmem:[%s3548_s1 + $0x28] sm:$0xff] }
  0x73   :  { %3791 = vst [vmem:[#allocation86_spill] sm:$0xff] %v2493_v5  ;;  %3792 = vst [vmem:[#allocation87_spill] sm:$0xff] %v2495_v27  ;;  %v389_v0 = vmul.f32 %v2507_v45, %v2493_v5  ;;  %v2534_v5 = vld [vmem:[%s3547_s0 + $0x28] sm:$0xff]  ;;  %v2545_v52 = vld [vmem:[#allocation2 + $0x1c0] sm:$0xff] }
  0x74   :  { %684 = vst [vmem:[#allocation5 + $0x180] sm:$0xff] %v583_v42  ;;  %3793 = vst [vmem:[#allocation88_spill] sm:$0xff] %v2500_v32  ;;  %v2514_v42 = vld [vmem:[%s3549_s2 + $0x1b8] sm:$0xff] }
  0x75   :  { %3794 = vst [vmem:[#allocation89_spill] sm:$0xff] %v2507_v45  ;;  %3795 = vst [vmem:[#allocation90_spill] sm:$0xff] %v2514_v42  ;;  %v489_v45 = vmul.f32 %v2527_v49, %v2495_v27  ;;  %v390_v54 = vmul.f32 %v2534_v5, %v2514_v42  ;;  %v2550_v27 = vld [vmem:[%s3549_s2 + $0x1c8] sm:$0xff]  ;;  %v2558_v42 = vld [vmem:[%s3547_s0 + $0x30] sm:$0xff] }
  0x76   :  { %3796 = vst [vmem:[#allocation91_spill] sm:$0xff] %v2516_v34  ;;  %3797 = vst [vmem:[#allocation92_spill] sm:$0xff] %v2521_v14 }
  0x77   :  { %685 = vst.msk [vmem:[#allocation5 + $0x188] sm:$0xff] %vm636_vm0, %v584_v36  ;;  %3798 = vst [vmem:[#allocation93_spill] sm:$0xff] %v2527_v49  ;;  %v490_v36 = vmul.f32 %v2541_v20, %v2516_v34  ;;  %v2552_v49 = vld [vmem:[#allocation2 + $0x1c8] sm:$0xff]  ;;  %v391_v34 = vmul.f32 %v2558_v42, %v2521_v14  ;;  %v2591_v14 = vld [vmem:[%s3548_s1 + $0x38] sm:$0xff] }
  0x78   :  { %3799 = vst [vmem:[#allocation94_spill] sm:$0xff] %v2534_v5  ;;  %3800 = vst [vmem:[#allocation95_spill] sm:$0xff] %v2541_v20  ;;  %v588_v5 = vsub.f32 %v388_v59, %v488_v60  ;;  %v2565_v20 = vld [vmem:[%s3548_s1 + $0x30] sm:$0xff]  ;;  %v2572_v60 = vld [vmem:[%s3547_s0 + $0x38] sm:$0xff] }
  0x79   :  { %3801 = vst [vmem:[#allocation96_spill] sm:$0xff] %v2545_v52  ;;  %3802 = vst [vmem:[#allocation97_spill] sm:$0xff] %v2550_v27  ;;  %v491_v32 = vmul.f32 %v2565_v20, %v2545_v52  ;;  %v2581_v59 = vld [vmem:[#allocation2 + $0x1d0] sm:$0xff]  ;;  %v589_v52 = vsub.f32 %v389_v0, %v489_v45  ;;  %v2609_v0 = vld [vmem:[#allocation2 + $0x1e0] sm:$0xff] }
  0x7a   :  { %3803 = vst [vmem:[#allocation98_spill] sm:$0xff] %v2552_v49  ;;  %686 = vst [vmem:[#allocation5 + $0x190] sm:$0xff] %v585_v21  ;;  %v392_v21 = vmul.f32 %v2572_v60, %v2550_v27  ;;  %v2598_v27 = vld [vmem:[%s3547_s0 + $0x40] sm:$0xff] }
  0x7b   :  { %687 = vst.msk [vmem:[#allocation5 + $0x198] sm:$0xff] %vm636_vm0, %v586_v38  ;;  %3804 = vst [vmem:[#allocation99_spill] sm:$0xff] %v2558_v42  ;;  %v2579_v38 = vld [vmem:[%s3549_s2 + $0x1d0] sm:$0xff]  ;;  %v2586_v42 = vld [vmem:[%s3549_s2 + $0x1d8] sm:$0xff]  ;;  %v591_v45 = vsub.f32 %v391_v34, %v491_v32 }
  0x7c   :  { %3805 = vst [vmem:[#allocation100_spill] sm:$0xff] %v2565_v20  ;;  %3806 = vst [vmem:[#allocation101_spill] sm:$0xff] %v2572_v60  ;;  %v590_v20 = vsub.f32 %v390_v54, %v490_v36  ;;  %v492_v60 = vmul.f32 %v2591_v14, %v2552_v49  ;;  %v393_v15 = vmul.f32 %v2598_v27, %v2579_v38  ;;  %v2607_v54 = vld [vmem:[%s3549_s2 + $0x1e0] sm:$0xff]  ;;  %v2636_v34 = vld [vmem:[%s3549_s2 + $0x1e8] sm:$0xff] }
  0x7d   :  { %3807 = vst [vmem:[#allocation102_spill] sm:$0xff] %v2579_v38  ;;  %3808 = vst [vmem:[#allocation103_spill] sm:$0xff] %v2581_v59 }
  0x7e   :  { %3809 = vst [vmem:[#allocation104_spill] sm:$0xff] %v2586_v42  ;;  %688 = vst [vmem:[#allocation5 + $0x1a0] sm:$0xff] %v587_v62  ;;  %v2615_v62 = vld [vmem:[%s3548_s1 + $0x40] sm:$0xff] }
  0x7f   :  { %3810 = vst [vmem:[#allocation105_spill] sm:$0xff] %v2591_v14  ;;  %3811 = vst [vmem:[#allocation106_spill] sm:$0xff] %v2598_v27  ;;  %v493_v36 = vmul.f32 %v2615_v62, %v2581_v59  ;;  %v2622_v27 = vld [vmem:[%s3547_s0 + $0x48] sm:$0xff] }
  0x80   :  { %3812 = vst [vmem:[#allocation107_spill] sm:$0xff] %v2602_v39  ;;  %3813 = vst [vmem:[#allocation108_spill] sm:$0xff] %v2607_v54  ;;  %v394_v38 = vmul.f32 %v2622_v27, %v2586_v42  ;;  %v2638_v59 = vld [vmem:[#allocation2 + $0x1e8] sm:$0xff]  ;;  %v2656_v42 = vld [vmem:[%s3548_s1 + $0x50] sm:$0xff] }
  0x81   :  { %3814 = vst [vmem:[#allocation109_spill] sm:$0xff] %v2609_v0  ;;  %689 = vst.msk [vmem:[#allocation5 + $0x1a8] sm:$0xff] %vm636_vm0, %v588_v5  ;;  %v2629_v5 = vld [vmem:[%s3548_s1 + $0x48] sm:$0xff]  ;;  %v495_v49 = vmul.f32 %v2656_v42, %v2609_v0  ;;  %v496_v14 = vmul.f32 %v2638_v59, %v1495_v35 }
  0x82   :  { %3815 = vst [vmem:[#allocation110_spill] sm:$0xff] %v2615_v62  ;;  %3816 = vst [vmem:[#allocation111_spill] sm:$0xff] %v2622_v27  ;;  %v494_v32 = vmul.f32 %v2629_v5, %v2602_v39  ;;  %v2643_v62 = vld [vmem:[%s3549_s2 + $0x1f0] sm:$0xff]  ;;  %v592_v27 = vsub.f32 %v392_v21, %v492_v60  ;;  %v2667_v60 = vld [vmem:[%s3549_s2 + $0x1f8] sm:$0xff] }
  0x83   :  { %3817 = vst [vmem:[#allocation112_spill] sm:$0xff] %v2629_v5  ;;  %3818 = vst [vmem:[#allocation113_spill] sm:$0xff] %v2636_v34  ;;  %v2649_v39 = vld [vmem:[%s3547_s0 + $0x50] sm:$0xff]  ;;  %v2669_v21 = vld [vmem:[#allocation2 + $0x1f8] sm:$0xff]  ;;  %v397_v0 = vmul.f32 %v2643_v62, %v1505_v43  ;;  %v398_v43 = vmul.f32 %v2667_v60, %v1519_v50 }
  0x84   :  { %3819 = vst [vmem:[#allocation114_spill] sm:$0xff] %v2643_v62  ;;  %690 = vst [vmem:[#allocation5 + $0x1b0] sm:$0xff] %v589_v52  ;;  %v395_v5 = vmul.f32 %v2649_v39, %v2607_v54  ;;  %v2662_v52 = vld [vmem:[#allocation2 + $0x1f0] sm:$0xff]  ;;  %v594_v54 = vsub.f32 %v394_v38, %v494_v32  ;;  %v498_v38 = vmul.f32 %v2669_v21, %v1524_v51  ;;  %v3831_v51 = vld [vmem:[#allocation11_spill] sm:$0xff] }
  0x85   :  { %691 = vst.msk [vmem:[#allocation5 + $0x1b8] sm:$0xff] %vm636_vm0, %v590_v20  ;;  %3820 = vst [vmem:[#allocation115_spill] sm:$0xff] %v2649_v39  ;;  %v396_v20 = vmul.f32 %v2636_v34, %v1488_v30  ;;  %v593_v39 = vsub.f32 %v393_v15, %v493_v36  ;;  %v2678_v30 = vld [vmem:[%s3549_s2 + $0x200] sm:$0xff]  ;;  %v497_v35 = vmul.f32 %v2662_v52, %v1510_v44  ;;  %v2699_v36 = vld [vmem:[%s3549_s2 + $0x210] sm:$0xff] }
  0x86   :  { %3821 = vst [vmem:[#allocation116_spill] sm:$0xff] %v2656_v42  ;;  %3822 = vst [vmem:[#allocation117_spill] sm:$0xff] %v2662_v52  ;;  %v2680_v34 = vld [vmem:[#allocation2 + $0x200] sm:$0xff]  ;;  %v2685_v42 = vld [vmem:[%s3549_s2 + $0x208] sm:$0xff]  ;;  %v595_v15 = vsub.f32 %v395_v5, %v495_v49  ;;  %v399_v44 = vmul.f32 %v2678_v30, %v1534_v58 }
  0x87   :  { %3823 = vst [vmem:[#allocation118_spill] sm:$0xff] %v2667_v60  ;;  %3824 = vst [vmem:[#allocation119_spill] sm:$0xff] %v2669_v21  ;;  %v2701_v32 = vld [vmem:[#allocation2 + $0x210] sm:$0xff]  ;;  %v499_v50 = vmul.f32 %v2680_v34, %v1542_v63  ;;  %v400_v49 = vmul.f32 %v2685_v42, %v3831_v51  ;;  %v2713_v5 = vld [vmem:[%s3549_s2 + $0x218] sm:$0xff]  ;;  %v597_v58 = vsub.f32 %v397_v0, %v497_v35 }
  0x88   :  { %692 = vst [vmem:[#allocation5 + $0x1c0] sm:$0xff] %v591_v45  ;;  %3825 = vst [vmem:[#allocation120_spill] sm:$0xff] %v2678_v30  ;;  %v2694_v45 = vld [vmem:[#allocation2 + $0x208] sm:$0xff]  ;;  %v2715_v21 = vld [vmem:[#allocation2 + $0x218] sm:$0xff] }
  0x89   :  { %3826 = vst [vmem:[#allocation121_spill] sm:$0xff] %v2680_v34  ;;  %3827 = vst [vmem:[#allocation122_spill] sm:$0xff] %v2685_v42  ;;  %v2726_v42 = vld [vmem:[#allocation2 + $0x220] sm:$0xff]  ;;  %v2731_v34 = vld [vmem:[%s3549_s2 + $0x228] sm:$0xff] }
  0x8a   :  { %693 = vst.msk [vmem:[#allocation5 + $0x1c8] sm:$0xff] %vm636_vm0, %v592_v27  ;;  %3828 = vst [vmem:[#allocation123_spill] sm:$0xff] %v2694_v45  ;;  %v596_v27 = vsub.f32 %v396_v20, %v496_v14  ;;  %v598_v14 = vsub.f32 %v398_v43, %v498_v38  ;;  %v3836_v20 = vld [vmem:[#allocation13_spill] sm:$0xff]  ;;  %v2733_v30 = vld [vmem:[#allocation2 + $0x228] sm:$0xff] }
  0x8b   :  { %3829 = vst [vmem:[#allocation124_spill] sm:$0xff] %v2699_v36  ;;  %3830 = vst [vmem:[#allocation125_spill] sm:$0xff] %v2701_v32  ;;  %v401_v51 = vmul.f32 %v2699_v36, %v3836_v20  ;;  %v3840_v0 = vld [vmem:[#allocation14_spill] sm:$0xff]  ;;  %v3841_v43 = vld [vmem:[#allocation15_spill] sm:$0xff] }
  0x8c   :  { %694 = vst [vmem:[#allocation5 + $0x1d0] sm:$0xff] %v593_v39  ;;  %695 = vst.msk [vmem:[#allocation5 + $0x1d8] sm:$0xff] %vm636_vm0, %v594_v54  ;;  %v2720_v39 = vld [vmem:[%s3549_s2 + $0x220] sm:$0xff]  ;;  %v3835_v54 = vld [vmem:[#allocation12_spill] sm:$0xff]  ;;  %v501_v35 = vmul.f32 %v2701_v32, %v3840_v0  ;;  %v402_v38 = vmul.f32 %v2713_v5, %v3841_v43 }
  0x8d   :  { %3832 = vst [vmem:[#allocation11_spill] sm:$0xff] %v2713_v5  ;;  %3833 = vst [vmem:[#allocation126_spill] sm:$0xff] %v2715_v21  ;;  %v500_v63 = vmul.f32 %v2694_v45, %v3835_v54  ;;  %v3842_v54 = vld [vmem:[#allocation16_spill] sm:$0xff]  ;;  %v2745_v36 = vld [vmem:[%s3549_s2 + $0x230] sm:$0xff] }
  0x8e   :  { %3834 = vst [vmem:[#allocation127_spill] sm:$0xff] %v2720_v39  ;;  %696 = vst [vmem:[#allocation5 + $0x1e0] sm:$0xff] %v595_v15  ;;  %v599_v15 = vsub.f32 %v399_v44, %v499_v50  ;;  %v502_v20 = vmul.f32 %v2715_v21, %v3842_v54  ;;  %v2747_v45 = vld [vmem:[#allocation2 + $0x230] sm:$0xff]  ;;  %v3847_v43 = vld [vmem:[#allocation18_spill] sm:$0xff] }
  0x8f   :  { %3837 = vst [vmem:[#allocation12_spill] sm:$0xff] %v2726_v42  ;;  %3838 = vst [vmem:[#allocation13_spill] sm:$0xff] %v2731_v34  ;;  %v600_v44 = vsub.f32 %v400_v49, %v500_v63  ;;  %v3846_v50 = vld [vmem:[#allocation17_spill] sm:$0xff]  ;;  %v503_v54 = vmul.f32 %v2726_v42, %v3847_v43  ;;  %v3848_v21 = vld [vmem:[#allocation19_spill] sm:$0xff]  ;;  %v601_v49 = vsub.f32 %v401_v51, %v501_v35 }
  0x90   :  { %3839 = vst [vmem:[#allocation128_spill] sm:$0xff] %v2733_v30  ;;  %697 = vst.msk [vmem:[#allocation5 + $0x1e8] sm:$0xff] %vm636_vm0, %v596_v27  ;;  %v2752_v27 = vld [vmem:[%s3549_s2 + $0x238] sm:$0xff]  ;;  %v403_v0 = vmul.f32 %v2720_v39, %v3846_v50  ;;  %v404_v5 = vmul.f32 %v2731_v34, %v3848_v21  ;;  %v2766_v60 = vld [vmem:[%s3549_s2 + $0x240] sm:$0xff] }
  0x91   :  { %3843 = vst [vmem:[#allocation14_spill] sm:$0xff] %v2745_v36  ;;  %3844 = vst [vmem:[#allocation15_spill] sm:$0xff] %v2747_v45  ;;  %v2761_v32 = vld [vmem:[#allocation2 + $0x238] sm:$0xff]  ;;  %v3852_v63 = vld [vmem:[#allocation20_spill] sm:$0xff] }
  0x92   :  { %3845 = vst [vmem:[#allocation16_spill] sm:$0xff] %v2752_v27  ;;  %698 = vst [vmem:[#allocation5 + $0x1f0] sm:$0xff] %v597_v58  ;;  %v2768_v58 = vld [vmem:[#allocation2 + $0x240] sm:$0xff]  ;;  %v504_v50 = vmul.f32 %v2733_v30, %v3852_v63  ;;  %v3853_v39 = vld [vmem:[#allocation21_spill] sm:$0xff]  ;;  %v603_v51 = vsub.f32 %v403_v0, %v503_v54 }
  0x93   :  { %699 = vst.msk [vmem:[#allocation5 + $0x1f8] sm:$0xff] %vm636_vm0, %v598_v14  ;;  %3849 = vst [vmem:[#allocation17_spill] sm:$0xff] %v2761_v32  ;;  %v602_v14 = vsub.f32 %v402_v38, %v502_v20  ;;  %v405_v43 = vmul.f32 %v2745_v36, %v3853_v39  ;;  %v2777_v21 = vld [vmem:[%s3549_s2 + $0x248] sm:$0xff]  ;;  %v2784_v42 = vld [vmem:[%s3549_s2 + $0x250] sm:$0xff] }
  0x94   :  { %3850 = vst [vmem:[#allocation18_spill] sm:$0xff] %v2766_v60  ;;  %3851 = vst [vmem:[#allocation19_spill] sm:$0xff] %v2768_v58  ;;  %v2779_v34 = vld [vmem:[#allocation2 + $0x248] sm:$0xff]  ;;  %v3858_v38 = vld [vmem:[#allocation23_spill] sm:$0xff] }
  0x95   :  { %700 = vst [vmem:[#allocation5 + $0x200] sm:$0xff] %v599_v15  ;;  %3854 = vst [vmem:[#allocation20_spill] sm:$0xff] %v2777_v21  ;;  %v3857_v15 = vld [vmem:[#allocation22_spill] sm:$0xff]  ;;  %v406_v39 = vmul.f32 %v2752_v27, %v3858_v38  ;;  %v3859_v20 = vld [vmem:[#allocation24_spill] sm:$0xff] }
  0x96   :  { %3855 = vst [vmem:[#allocation21_spill] sm:$0xff] %v2779_v34  ;;  %3856 = vst [vmem:[#allocation129_spill] sm:$0xff] %v2784_v42  ;;  %v505_v35 = vmul.f32 %v2747_v45, %v3857_v15  ;;  %v506_v63 = vmul.f32 %v2761_v32, %v3859_v20  ;;  %v2793_v36 = vld [vmem:[#allocation2 + $0x250] sm:$0xff]  ;;  %v2798_v30 = vld [vmem:[%s3549_s2 + $0x258] sm:$0xff] }
  0x97   :  { %701 = vst.msk [vmem:[#allocation5 + $0x208] sm:$0xff] %vm636_vm0, %v600_v44  ;;  %3860 = vst [vmem:[#allocation22_spill] sm:$0xff] %v2793_v36  ;;  %v2800_v52 = vld [vmem:[#allocation2 + $0x258] sm:$0xff]  ;;  %v604_v44 = vsub.f32 %v404_v5, %v504_v50  ;;  %v3863_v0 = vld [vmem:[#allocation25_spill] sm:$0xff] }
  0x98   :  { %3861 = vst [vmem:[#allocation23_spill] sm:$0xff] %v2798_v30  ;;  %3862 = vst [vmem:[#allocation24_spill] sm:$0xff] %v2800_v52  ;;  %v407_v54 = vmul.f32 %v2766_v60, %v3863_v0  ;;  %v3864_v15 = vld [vmem:[#allocation26_spill] sm:$0xff]  ;;  %v3865_v20 = vld [vmem:[#allocation27_spill] sm:$0xff] }
  0x99   :  { %702 = vst [vmem:[#allocation5 + $0x210] sm:$0xff] %v601_v49  ;;  %703 = vst.msk [vmem:[#allocation5 + $0x218] sm:$0xff] %vm636_vm0, %v602_v14  ;;  %v507_v38 = vmul.f32 %v2768_v58, %v3864_v15  ;;  %v408_v32 = vmul.f32 %v2777_v21, %v3865_v20  ;;  %v2812_v27 = vld [vmem:[%s3549_s2 + $0x260] sm:$0xff]  ;;  %v2819_v5 = vld [vmem:[%s3549_s2 + $0x268] sm:$0xff]  ;;  %v605_v49 = vsub.f32 %v405_v43, %v505_v35 }
  0x9a   :  { %3866 = vst [vmem:[#allocation25_spill] sm:$0xff] %v2812_v27  ;;  %v2814_v45 = vld [vmem:[#allocation2 + $0x260] sm:$0xff]  ;;  %3868 = vst [vmem:[#allocation27_spill] sm:$0xff] %v2819_v5  ;;  %v606_v14 = vsub.f32 %v406_v39, %v506_v63  ;;  %v3869_v50 = vld [vmem:[#allocation28_spill] sm:$0xff] }
  0x9b   :  { %3867 = vst [vmem:[#allocation26_spill] sm:$0xff] %v2814_v45  ;;  %704 = vst [vmem:[#allocation5 + $0x220] sm:$0xff] %v603_v51  ;;  %v508_v0 = vmul.f32 %v2779_v34, %v3869_v50  ;;  %v3870_v15 = vld [vmem:[#allocation29_spill] sm:$0xff]  ;;  %v2825_v21 = vld [vmem:[#allocation2 + $0x268] sm:$0xff]  ;;  %v607_v60 = vsub.f32 %v407_v54, %v507_v38 }
  0x9c   :  { %v409_v20 = vmul.f32 %v2784_v42, %v3870_v15  ;;  %v2830_v58 = vld [vmem:[%s3549_s2 + $0x270] sm:$0xff]  ;;  %705 = vst.msk [vmem:[#allocation5 + $0x228] sm:$0xff] %vm636_vm0, %v604_v44  ;;  %v3872_v62 = vld [vmem:[#allocation30_spill] sm:$0xff]  ;;  %v3873_v51 = vld [vmem:[#allocation31_spill] sm:$0xff] }
  0x9d   :  { %3871 = vst [vmem:[#allocation28_spill] sm:$0xff] %v2830_v58  ;;  %v509_v43 = vmul.f32 %v2793_v36, %v3872_v62  ;;  %v410_v35 = vmul.f32 %v2798_v30, %v3873_v51  ;;  %v3874_v39 = vld [vmem:[#allocation32_spill] sm:$0xff]  ;;  %v2839_v50 = vld [vmem:[#allocation2 + $0x270] sm:$0xff]  ;;  %v2844_v15 = vld [vmem:[%s3549_s2 + $0x278] sm:$0xff]  ;;  %v608_v44 = vsub.f32 %v408_v32, %v508_v0 }
  0x9e   :  { %v510_v63 = vmul.f32 %v2800_v52, %v3874_v39  ;;  %v2846_v42 = vld [vmem:[#allocation2 + $0x278] sm:$0xff]  ;;  %706 = vst [vmem:[#allocation5 + $0x230] sm:$0xff] %v605_v49  ;;  %707 = vst.msk [vmem:[#allocation5 + $0x238] sm:$0xff] %vm636_vm0, %v606_v14  ;;  %v3875_v62 = vld [vmem:[#allocation33_spill] sm:$0xff] }
  0x9f   :  { %v411_v54 = vmul.f32 %v2812_v27, %v3875_v62  ;;  %v3876_v38 = vld [vmem:[#allocation34_spill] sm:$0xff]  ;;  %v3877_v39 = vld [vmem:[#allocation35_spill] sm:$0xff]  ;;  %v2865_v32 = vld [vmem:[%s3549_s2 + $0x288] sm:$0xff]  ;;  %708 = vst [vmem:[#allocation5 + $0x240] sm:$0xff] %v607_v60  ;;  %v609_v49 = vsub.f32 %v409_v20, %v509_v43 }
  0xa0   :  { %v511_v51 = vmul.f32 %v2814_v45, %v3876_v38  ;;  %v412_v52 = vmul.f32 %v2819_v5, %v3877_v39  ;;  %v2858_v30 = vld [vmem:[%s3549_s2 + $0x280] sm:$0xff]  ;;  %3878 = vst [vmem:[#allocation29_spill] sm:$0xff] %v2865_v32  ;;  %v610_v14 = vsub.f32 %v410_v35, %v510_v63  ;;  %v3879_v0 = vld [vmem:[#allocation36_spill] sm:$0xff]  ;;  %v3880_v38 = vld [vmem:[#allocation37_spill] sm:$0xff] }
  0xa1   :  { %v2860_v36 = vld [vmem:[#allocation2 + $0x280] sm:$0xff]  ;;  %v512_v62 = vmul.f32 %v2825_v21, %v3879_v0  ;;  %v413_v39 = vmul.f32 %v2830_v58, %v3880_v38  ;;  %v2871_v5 = vld [vmem:[#allocation2 + $0x288] sm:$0xff]  ;;  %v2876_v45 = vld [vmem:[%s3549_s2 + $0x290] sm:$0xff]  ;;  %709 = vst.msk [vmem:[#allocation5 + $0x248] sm:$0xff] %vm636_vm0, %v608_v44 }
  0xa2   :  { %v611_v27 = vsub.f32 %v411_v54, %v511_v51  ;;  %v3881_v34 = vld [vmem:[#allocation38_spill] sm:$0xff]  ;;  %v3882_v20 = vld [vmem:[#allocation39_spill] sm:$0xff]  ;;  %v3883_v35 = vld [vmem:[#allocation40_spill] sm:$0xff]  ;;  %710 = vst [vmem:[#allocation5 + $0x250] sm:$0xff] %v609_v49  ;;  %v515_v54 = vmul.f32 %v2860_v36, %v1910_v40  ;;  %v416_v51 = vmul.f32 %v2865_v32, %v1924_v18  ;;  %v516_v40 = vmul.f32 %v2871_v5, %v1929_v47 }
  0xa3   :  { %v513_v60 = vmul.f32 %v2839_v50, %v3881_v34  ;;  %v414_v43 = vmul.f32 %v2844_v15, %v3882_v20  ;;  %v514_v63 = vmul.f32 %v2846_v42, %v3883_v35  ;;  %v2885_v0 = vld [vmem:[#allocation2 + $0x290] sm:$0xff]  ;;  %v2890_v38 = vld [vmem:[%s3549_s2 + $0x298] sm:$0xff]  ;;  %711 = vst.msk [vmem:[#allocation5 + $0x258] sm:$0xff] %vm636_vm0, %v610_v14  ;;  %v612_v44 = vsub.f32 %v412_v52, %v512_v62  ;;  %v2904_v20 = vld [vmem:[%s3549_s2 + $0x2a0] sm:$0xff] }
  0xa4   :  { %v2892_v58 = vld [vmem:[#allocation2 + $0x298] sm:$0xff]  ;;  %v415_v34 = vmul.f32 %v2858_v30, %v1905_v56  ;;  %v2906_v35 = vld [vmem:[#allocation2 + $0x2a0] sm:$0xff]  ;;  %v2911_v52 = vld [vmem:[%s3549_s2 + $0x2a8] sm:$0xff]  ;;  %712 = vst [vmem:[#allocation5 + $0x260] sm:$0xff] %v611_v27  ;;  %v417_v18 = vmul.f32 %v2876_v45, %v1946_v11  ;;  %v517_v27 = vmul.f32 %v2885_v0, %v1960_v31  ;;  %v419_v31 = vmul.f32 %v2904_v20, %v2000_v4 }
  0xa5   :  { %v613_v56 = vsub.f32 %v413_v39, %v513_v60  ;;  %v614_v49 = vsub.f32 %v414_v43, %v514_v63  ;;  %v2917_v14 = vld [vmem:[#allocation2 + $0x2a8] sm:$0xff]  ;;  %v2922_v62 = vld [vmem:[%s3549_s2 + $0x2b0] sm:$0xff]  ;;  %713 = vst.msk [vmem:[#allocation5 + $0x268] sm:$0xff] %vm636_vm0, %v612_v44  ;;  %v418_v39 = vmul.f32 %v2890_v38, %v1981_v33  ;;  %v518_v47 = vmul.f32 %v2892_v58, %v1986_v46  ;;  %v2936_v60 = vld [vmem:[%s3549_s2 + $0x2b8] sm:$0xff] }
  0xa6   :  { %v615_v32 = vsub.f32 %v415_v34, %v515_v54  ;;  %v2931_v11 = vld [vmem:[#allocation2 + $0x2b0] sm:$0xff]  ;;  %3884 = vst [vmem:[#allocation30_spill] sm:$0xff] %v2936_v60  ;;  %v2938_v43 = vld [vmem:[#allocation2 + $0x2b8] sm:$0xff]  ;;  %v616_v63 = vsub.f32 %v416_v51, %v516_v40  ;;  %v519_v33 = vmul.f32 %v2906_v35, %v2005_v57  ;;  %v420_v46 = vmul.f32 %v2911_v52, %v2021_v22  ;;  %v2950_v44 = vld [vmem:[%s3549_s2 + $0x2c0] sm:$0xff] }
  0xa7   :  { %3885 = vst [vmem:[#allocation31_spill] sm:$0xff] %v2938_v43  ;;  %714 = vst [vmem:[#allocation5 + $0x270] sm:$0xff] %v613_v56  ;;  %v2952_v34 = vld [vmem:[#allocation2 + $0x2c0] sm:$0xff]  ;;  %v2957_v54 = vld [vmem:[%s3549_s2 + $0x2c8] sm:$0xff]  ;;  %v617_v4 = vsub.f32 %v417_v18, %v517_v27  ;;  %v618_v51 = vsub.f32 %v418_v39, %v518_v47  ;;  %v520_v57 = vmul.f32 %v2917_v14, %v2036_v29 }
  0xa8   :  { %715 = vst.msk [vmem:[#allocation5 + $0x278] sm:$0xff] %vm636_vm0, %v614_v49  ;;  %3886 = vst [vmem:[#allocation32_spill] sm:$0xff] %v2950_v44  ;;  %v421_v22 = vmul.f32 %v2922_v62, %v2054_v3  ;;  %v2963_v56 = vld [vmem:[#allocation2 + $0x2c8] sm:$0xff]  ;;  %v2968_v49 = vld [vmem:[%s3549_s2 + $0x2d0] sm:$0xff]  ;;  %v619_v40 = vsub.f32 %v419_v31, %v519_v33  ;;  %v422_v18 = vmul.f32 %v2936_v60, %v2073_v19 }
  0xa9   :  { %3887 = vst [vmem:[#allocation33_spill] sm:$0xff] %v2952_v34  ;;  %3888 = vst [vmem:[#allocation34_spill] sm:$0xff] %v2957_v54  ;;  %v522_v29 = vmul.f32 %v2938_v43, %v2078_v48  ;;  %v2977_v3 = vld [vmem:[#allocation2 + $0x2d0] sm:$0xff]  ;;  %v2982_v27 = vld [vmem:[%s3549_s2 + $0x2d8] sm:$0xff]  ;;  %v620_v47 = vsub.f32 %v420_v46, %v520_v57  ;;  %v523_v19 = vmul.f32 %v2952_v34, %v2111_v26 }
  0xaa   :  { %716 = vst [vmem:[#allocation5 + $0x280] sm:$0xff] %v615_v32  ;;  %3889 = vst [vmem:[#allocation35_spill] sm:$0xff] %v2963_v56  ;;  %v521_v32 = vmul.f32 %v2931_v11, %v2059_v37  ;;  %v2984_v39 = vld [vmem:[#allocation2 + $0x2d8] sm:$0xff]  ;;  %v423_v37 = vmul.f32 %v2950_v44, %v2098_v2  ;;  %v424_v48 = vmul.f32 %v2957_v54, %v2130_v53  ;;  %v2998_v31 = vld [vmem:[#allocation2 + $0x2e0] sm:$0xff] }
  0xab   :  { %3890 = vst [vmem:[#allocation36_spill] sm:$0xff] %v2968_v49  ;;  %717 = vst.msk [vmem:[#allocation5 + $0x288] sm:$0xff] %vm636_vm0, %v616_v63  ;;  %v2996_v63 = vld [vmem:[%s3549_s2 + $0x2e0] sm:$0xff]  ;;  %v3003_v33 = vld [vmem:[%s3549_s2 + $0x2e8] sm:$0xff]  ;;  %v622_v46 = vsub.f32 %v422_v18, %v522_v29  ;;  %v524_v26 = vmul.f32 %v2963_v56, %v2135_v17 }
  0xac   :  { %3891 = vst [vmem:[#allocation37_spill] sm:$0xff] %v2977_v3  ;;  %3892 = vst [vmem:[#allocation38_spill] sm:$0xff] %v2982_v27  ;;  %v621_v2 = vsub.f32 %v421_v22, %v521_v32  ;;  %v3014_v57 = vld [vmem:[%s3549_s2 + $0x2f0] sm:$0xff]  ;;  %v623_v54 = vsub.f32 %v423_v37, %v523_v19  ;;  %v525_v22 = vmul.f32 %v2977_v3, %v2154_v8  ;;  %v3030_v56 = vld [vmem:[#allocation2 + $0x2f8] sm:$0xff] }
  0xad   :  { %3893 = vst [vmem:[#allocation39_spill] sm:$0xff] %v2984_v39  ;;  %718 = vst [vmem:[#allocation5 + $0x290] sm:$0xff] %v617_v4  ;;  %v425_v4 = vmul.f32 %v2968_v49, %v2149_v55  ;;  %v3899_v32 = vld [vmem:[#allocation45_spill] sm:$0xff]  ;;  %v3028_v49 = vld [vmem:[%s3549_s2 + $0x2f8] sm:$0xff]  ;;  %v427_v37 = vmul.f32 %v2996_v63, %v2206_v23  ;;  %v527_v19 = vmul.f32 %v2998_v31, %v2211_v7 }
  0xae   :  { %719 = vst.msk [vmem:[#allocation5 + $0x298] sm:$0xff] %vm636_vm0, %v618_v51  ;;  %3894 = vst [vmem:[#allocation40_spill] sm:$0xff] %v2996_v63  ;;  %v3009_v51 = vld [vmem:[#allocation2 + $0x2e8] sm:$0xff]  ;;  %v526_v18 = vmul.f32 %v2984_v39, %v3899_v32  ;;  %v3023_v29 = vld [vmem:[#allocation2 + $0x2f0] sm:$0xff]  ;;  %v428_v39 = vmul.f32 %v3003_v33, %v2225_v28 }
  0xaf   :  { %3895 = vst [vmem:[#allocation130_spill] sm:$0xff] %v2998_v31  ;;  %3896 = vst [vmem:[#allocation131_spill] sm:$0xff] %v3003_v33  ;;  %v3044_v3 = vld [vmem:[#allocation2 + $0x300] sm:$0xff]  ;;  %v429_v33 = vmul.f32 %v3014_v57, %v2247_v6  ;;  %v3055_v63 = vld [vmem:[#allocation2 + $0x308] sm:$0xff]  ;;  %v627_v44 = vsub.f32 %v427_v37, %v527_v19 }
  0xb0   :  { %720 = vst [vmem:[#allocation5 + $0x2a0] sm:$0xff] %v619_v40  ;;  %3897 = vst [vmem:[#allocation132_spill] sm:$0xff] %v3009_v51  ;;  %v426_v40 = vmul.f32 %v2982_v27, %v2171_v16  ;;  %v3042_v27 = vld [vmem:[%s3549_s2 + $0x300] sm:$0xff]  ;;  %v3060_v34 = vld [vmem:[%s3549_s2 + $0x310] sm:$0xff] }
  0xb1   :  { %3898 = vst [vmem:[#allocation133_spill] sm:$0xff] %v3014_v57  ;;  %721 = vst.msk [vmem:[#allocation5 + $0x2a8] sm:$0xff] %vm636_vm0, %v620_v47  ;;  %v624_v47 = vsub.f32 %v424_v48, %v524_v26  ;;  %v3049_v48 = vld [vmem:[%s3549_s2 + $0x308] sm:$0xff]  ;;  %v3905_v26 = vld [vmem:[#allocation50_spill] sm:$0xff]  ;;  %v431_v37 = vmul.f32 %v3042_v27, %v2299_v12 }
  0xb2   :  { %3900 = vst [vmem:[#allocation45_spill] sm:$0xff] %v3023_v29  ;;  %3901 = vst [vmem:[#allocation134_spill] sm:$0xff] %v3028_v49  ;;  %v528_v31 = vmul.f32 %v3009_v51, %v3905_v26  ;;  %v3076_v57 = vld [vmem:[#allocation2 + $0x318] sm:$0xff]  ;;  %v3911_v19 = vld [vmem:[#allocation57_spill] sm:$0xff] }
  0xb3   :  { %3902 = vst [vmem:[#allocation135_spill] sm:$0xff] %v3030_v56  ;;  %722 = vst [vmem:[#allocation5 + $0x2b0] sm:$0xff] %v621_v2  ;;  %v625_v2 = vsub.f32 %v425_v4, %v525_v22  ;;  %v430_v4 = vmul.f32 %v3028_v49, %v2280_v25  ;;  %v530_v22 = vmul.f32 %v3030_v56, %v2285_v24  ;;  %v3912_v43 = vld [vmem:[#allocation60_spill] sm:$0xff] }
  0xb4   :  { %723 = vst.msk [vmem:[#allocation5 + $0x2b8] sm:$0xff] %vm636_vm0, %v622_v46  ;;  %3903 = vst [vmem:[#allocation136_spill] sm:$0xff] %v3044_v3  ;;  %v626_v46 = vsub.f32 %v426_v40, %v526_v18  ;;  %v3069_v40 = vld [vmem:[#allocation2 + $0x310] sm:$0xff]  ;;  %v3074_v18 = vld [vmem:[%s3549_s2 + $0x318] sm:$0xff]  ;;  %v531_v49 = vmul.f32 %v3044_v3, %v3911_v19  ;;  %v432_v56 = vmul.f32 %v3049_v48, %v2322_v1  ;;  %s1343_s2 = smov [#allocation5]  }
  0xb5   :  { %3904 = vst [vmem:[#allocation137_spill] sm:$0xff] %v3049_v48  ;;  %724 = vst [vmem:[#allocation5 + $0x2c0] sm:$0xff] %v623_v54  ;;  %v529_v54 = vmul.f32 %v3023_v29, %v2260_v41  ;;  %v630_v51 = vsub.f32 %v430_v4, %v530_v22  ;;  %v532_v60 = vmul.f32 %v3055_v63, %v3912_v43  ;;  %s1141_s11 = sshll.u32 %s1343_s2, 4  ;;  %v3914_v4 = vld [vmem:[#allocation69_spill] sm:$0xff]  ;;  %s1142_s11 = int_to_ptr.vmem [resolvable:$true] %s1141_s11 }
  0xb6   :  { %3906 = vst [vmem:[#allocation50_spill] sm:$0xff] %v3055_v63  ;;  %3907 = vst [vmem:[#allocation138_spill] sm:$0xff] %v3060_v34  ;;  %v3916_v63 = vld [vmem:[#allocation75_spill] sm:$0xff]  ;;  %s1294_s12 = scalar_lea.vmem %s1142_s11, 12800  ;;  %p1299_p6 = scmp.lt.s32.totalorder %s1142_s11, %s1142_s11 }
  0xb7   :  { %725 = vst.msk [vmem:[#allocation5 + $0x2c8] sm:$0xff] %vm636_vm0, %v624_v47  ;;  %3908 = vst [vmem:[#allocation139_spill] sm:$0xff] %v3069_v40  ;;  %v628_v47 = vsub.f32 %v428_v39, %v528_v31  ;;  %v629_v29 = vsub.f32 %v429_v33, %v529_v54  ;;  %v631_v39 = vsub.f32 %v431_v37, %v531_v49  ;;  %v3913_v54 = vld [vmem:[#allocation65_spill] sm:$0xff]  ;;  %p1295_p5 = scmp.ne.s32.totalorder %s1142_s11, %s1294_s12  ;;  %p1300_p7 = scmp.lt.s32.totalorder %s1294_s12, %s1294_s12 }
  0xb8   :  { %3909 = vst [vmem:[#allocation140_spill] sm:$0xff] %v3074_v18  ;;  %3910 = vst [vmem:[#allocation141_spill] sm:$0xff] %v3076_v57  ;;  %v533_v31 = vmul.f32 %v3069_v40, %v2360_v10  ;;  %v632_v33 = vsub.f32 %v432_v56, %v532_v60  ;;  %v973_v22 = vadd.f32 %v3914_v4, %v3913_v54  ;;  %v3917_v49 = vld [vmem:[#allocation41_spill] sm:$0xff]  ;;  %v3920_v60 = vld [vmem:[#allocation44_spill] sm:$0xff] }
  0xb9   :  { %726 = vst [vmem:[#allocation5 + $0x2d0] sm:$0xff] %v625_v2  ;;  %727 = vst.msk [vmem:[#allocation5 + $0x2d8] sm:$0xff] %vm636_vm0, %v626_v46  ;;  %v433_v2 = vmul.f32 %v3060_v34, %v2355_v61  ;;  %v434_v46 = vmul.f32 %v3074_v18, %v2374_v9  ;;  %v3915_v34 = vld [vmem:[#allocation70_spill] sm:$0xff]  ;;  %v775_v37 = vmul.f32 %v3917_v49, %v2135_v17  ;;  %p1301_p8 = por %p1300_p7, %p1299_p6 }
  0xba   :  { %728 = vst [vmem:[#allocation5 + $0x2e0] sm:$0xff] %v627_v44  ;;  %729 = vst.msk [vmem:[#allocation5 + $0x2e8] sm:$0xff] %vm636_vm0, %v628_v47  ;;  %v534_v44 = vmul.f32 %v3076_v57, %v2379_v13  ;;  %v974_v47 = vadd.f32 %v3916_v63, %v3915_v34  ;;  %v3918_v18 = vld [vmem:[#allocation42_spill] sm:$0xff]  ;;  %v876_v34 = vmul.f32 %v3920_v60, %v2149_v55  ;;  %v3922_v63 = vld [vmem:[#allocation47_spill] sm:$0xff] }
  0xbb   :  { %730 = vst [vmem:[#allocation5 + $0x2f0] sm:$0xff] %v629_v29  ;;  %731 = vst.msk [vmem:[#allocation5 + $0x2f8] sm:$0xff] %vm636_vm0, %v630_v51  ;;  %v633_v40 = vsub.f32 %v433_v2, %v533_v31  ;;  %v875_v3 = vmul.f32 %v3918_v18, %v2130_v53  ;;  %v3919_v29 = vld [vmem:[#allocation43_spill] sm:$0xff]  ;;  %v3921_v17 = vld [vmem:[#allocation46_spill] sm:$0xff]  ;;  %v877_v51 = vmul.f32 %v3922_v63, %v2171_v16  ;;  %p1302_p9 = pnand %p1301_p8, %p1295_p5 }
  0xbc   :  { %732 = vst [vmem:[#allocation5 + $0x300] sm:$0xff] %v631_v39  ;;  %v634_v48 = vsub.f32 %v434_v46, %v534_v44  ;;  %v776_v57 = vmul.f32 %v3919_v29, %v2154_v8  ;;  %733 = vst.msk [vmem:[#allocation5 + $0x308] sm:$0xff] %vm636_vm0, %v632_v33  ;;  %v777_v56 = vmul.f32 %v3921_v17, %v3899_v32  ;;  %v3923_v53 = vld [vmem:[#allocation48_spill] sm:$0xff]  ;;  %v3924_v2 = vld [vmem:[#allocation49_spill] sm:$0xff] }
  0xbd   :  { %1073 = vst.msk [vmem:[#allocation6 + $0x128] sm:$0xff] %vm636_vm0, %v973_v22  ;;  %1074 = vst [vmem:[#allocation6 + $0x130] sm:$0xff] %v974_v47  ;;  %v778_v18 = vmul.f32 %v3923_v53, %v2211_v7  ;;  %v975_v8 = vadd.f32 %v875_v3, %v775_v37  ;;  %v878_v39 = vmul.f32 %v3924_v2, %v2206_v23  ;;  %v3925_v31 = vld [vmem:[#allocation51_spill] sm:$0xff]  ;;  %v3926_v55 = vld [vmem:[#allocation52_spill] sm:$0xff] }
  0xbe   :  { %734 = vst [vmem:[#allocation5 + $0x310] sm:$0xff] %v633_v40  ;;  %735 = vst.msk [vmem:[#allocation5 + $0x318] sm:$0xff] %vm636_vm0, %v634_v48  ;;  %v779_v46 = vmul.f32 %v3925_v31, %v3905_v26  ;;  %v879_v44 = vmul.f32 %v3926_v55, %v2225_v28  ;;  %v976_v32 = vadd.f32 %v876_v34, %v776_v57  ;;  %v3927_v16 = vld [vmem:[#allocation53_spill] sm:$0xff]  ;;  %v3928_v7 = vld [vmem:[#allocation54_spill] sm:$0xff] }
  0xbf   :  { %v977_v33 = vadd.f32 %v877_v51, %v777_v56  ;;  %v780_v54 = vmul.f32 %v3927_v16, %v2260_v41  ;;  %v880_v40 = vmul.f32 %v3928_v7, %v2247_v6 }
  0xc0   :  { %1305 = shalt.err (!%p1302_p9)
}
  0xc1   :  { %1147 = dma.vmem_to_hbm [thread:$0]  %s1142_s11, 12800, %s3551_s4, [#allocation4], %s1341_s21, %s1341_s21, %s1342_s22   ;;  %1075 = vst.msk [vmem:[#allocation6 + $0x138] sm:$0xff] %vm636_vm0, %v975_v8  ;;  %v978_v23 = vadd.f32 %v878_v39, %v778_v18  ;;  %v979_v28 = vadd.f32 %v879_v44, %v779_v46  ;;  %v3929_v6 = vld [vmem:[#allocation55_spill] sm:$0xff]  ;;  %v3930_v3 = vld [vmem:[#allocation56_spill] sm:$0xff]  ;;  %1076 = vst [vmem:[#allocation6 + $0x140] sm:$0xff] %v976_v32  ;;  %v980_v48 = vadd.f32 %v880_v40, %v780_v54 }
  0xc2   :  { %v781_v41 = vmul.f32 %v3929_v6, %v2285_v24  ;;  %v881_v57 = vmul.f32 %v3930_v3, %v2280_v25  ;;  %1077 = vst.msk [vmem:[#allocation6 + $0x148] sm:$0xff] %vm636_vm0, %v977_v33  ;;  %v3931_v26 = vld [vmem:[#allocation58_spill] sm:$0xff]  ;;  %v3932_v22 = vld [vmem:[#allocation59_spill] sm:$0xff]  ;;  %v3933_v49 = vld [vmem:[#allocation61_spill] sm:$0xff]  ;;  %s1344_s13 = smov [#allocation6]  }
  0xc3   :  { %v782_v4 = vmul.f32 %v3931_v26, %v3911_v19  ;;  %v882_v47 = vmul.f32 %v3932_v22, %v2299_v12  ;;  %v783_v37 = vmul.f32 %v3933_v49, %v3912_v43  ;;  %1078 = vst [vmem:[#allocation6 + $0x150] sm:$0xff] %v978_v23  ;;  %1079 = vst.msk [vmem:[#allocation6 + $0x158] sm:$0xff] %vm636_vm0, %v979_v28  ;;  %v3934_v29 = vld [vmem:[#allocation62_spill] sm:$0xff]  ;;  %v3935_v60 = vld [vmem:[#allocation63_spill] sm:$0xff]  ;;  %s1153_s14 = sshll.u32 %s1344_s13, 4  ;;  %s1154_s14 = int_to_ptr.vmem [resolvable:$true] %s1153_s14 }
  0xc4   :  { %v981_v24 = vadd.f32 %v881_v57, %v781_v41  ;;  %v883_v25 = vmul.f32 %v3934_v29, %v2322_v1  ;;  %v784_v34 = vmul.f32 %v3935_v60, %v2360_v10  ;;  %v3936_v17 = vld [vmem:[#allocation64_spill] sm:$0xff]  ;;  %1080 = vst [vmem:[#allocation6 + $0x160] sm:$0xff] %v980_v48  ;;  %v3937_v12 = vld [vmem:[#allocation66_spill] sm:$0xff]  ;;  %v3938_v43 = vld [vmem:[#allocation67_spill] sm:$0xff]  ;;  %p1319_p11 = scmp.lt.s32.totalorder %s1154_s14, %s1154_s14 }
  0xc5   :  { %v884_v56 = vmul.f32 %v3936_v17, %v2355_v61  ;;  %v982_v19 = vadd.f32 %v882_v47, %v782_v4  ;;  %v785_v63 = vmul.f32 %v3937_v12, %v2379_v13  ;;  %v885_v51 = vmul.f32 %v3938_v43, %v2374_v9  ;;  %v3939_v53 = vld [vmem:[#allocation68_spill] sm:$0xff]  ;;  %v3941_v39 = vld [vmem:[#allocation71_spill] sm:$0xff]  ;;  %v3943_v46 = vld [vmem:[#allocation73_spill] sm:$0xff] }
  0xc6   :  { %v3940_v18 = vld [vmem:[#allocation76_spill] sm:$0xff]  ;;  %1081 = vst.msk [vmem:[#allocation6 + $0x168] sm:$0xff] %vm636_vm0, %v981_v24  ;;  %v983_v1 = vadd.f32 %v883_v25, %v783_v37  ;;  %v3944_v61 = vld [vmem:[#allocation78_spill] sm:$0xff]  ;;  %v3946_v13 = vld [vmem:[#allocation77_spill] sm:$0xff] }
  0xc7   :  { %v786_v8 = vmul.f32 %v3940_v18, %v3939_v53  ;;  %v984_v2 = vadd.f32 %v884_v56, %v784_v34  ;;  %v3942_v10 = vld [vmem:[#allocation72_spill] sm:$0xff]  ;;  %v787_v55 = vmul.f32 %v3944_v61, %v3943_v46  ;;  %1082 = vst [vmem:[#allocation6 + $0x170] sm:$0xff] %v982_v19  ;;  %v985_v44 = vadd.f32 %v885_v51, %v785_v63  ;;  %v3945_v32 = vld [vmem:[#allocation74_spill] sm:$0xff]  ;;  %v3947_v16 = vld [vmem:[#allocation79_spill] sm:$0xff] }
  0xc8   :  { %v886_v31 = vmul.f32 %v3942_v10, %v3941_v39  ;;  %v887_v33 = vmul.f32 %v3946_v13, %v3945_v32  ;;  %v3948_v9 = vld [vmem:[#allocation83_spill] sm:$0xff]  ;;  %v3949_v7 = vld [vmem:[#allocation80_spill] sm:$0xff]  ;;  %v3950_v40 = vld [vmem:[#allocation82_spill] sm:$0xff]  ;;  %1083 = vst.msk [vmem:[#allocation6 + $0x178] sm:$0xff] %vm636_vm0, %v983_v1 }
  0xc9   :  { %v788_v54 = vmul.f32 %v3948_v9, %v3947_v16  ;;  %v888_v23 = vmul.f32 %v3950_v40, %v3949_v7  ;;  %1084 = vst [vmem:[#allocation6 + $0x180] sm:$0xff] %v984_v2  ;;  %v3951_v6 = vld [vmem:[#allocation81_spill] sm:$0xff]  ;;  %v3952_v41 = vld [vmem:[#allocation88_spill] sm:$0xff]  ;;  %v3955_v4 = vld [vmem:[#allocation86_spill] sm:$0xff] }
  0xca   :  { %v986_v28 = vadd.f32 %v886_v31, %v786_v8  ;;  %v789_v3 = vmul.f32 %v3952_v41, %v3951_v6  ;;  %v3953_v57 = vld [vmem:[#allocation84_spill] sm:$0xff]  ;;  %v3954_v48 = vld [vmem:[#allocation85_spill] sm:$0xff]  ;;  %1085 = vst.msk [vmem:[#allocation6 + $0x188] sm:$0xff] %vm636_vm0, %v985_v44  ;;  %v987_v49 = vadd.f32 %v887_v33, %v787_v55  ;;  %v3957_v24 = vld [vmem:[#allocation87_spill] sm:$0xff] }
  0xcb   :  { %v889_v26 = vmul.f32 %v3954_v48, %v3953_v57  ;;  %v3956_v22 = vld [vmem:[#allocation93_spill] sm:$0xff]  ;;  %v988_v37 = vadd.f32 %v888_v23, %v788_v54  ;;  %v3959_v60 = vld [vmem:[#allocation90_spill] sm:$0xff]  ;;  %v3960_v34 = vld [vmem:[#allocation95_spill] sm:$0xff] }
  0xcc   :  { %v790_v47 = vmul.f32 %v3956_v22, %v3955_v4  ;;  %v3958_v29 = vld [vmem:[#allocation89_spill] sm:$0xff]  ;;  %v791_v17 = vmul.f32 %v3960_v34, %v3959_v60  ;;  %1086 = vst [vmem:[#allocation6 + $0x190] sm:$0xff] %v986_v28  ;;  %v3961_v19 = vld [vmem:[#allocation91_spill] sm:$0xff]  ;;  %v3962_v12 = vld [vmem:[#allocation94_spill] sm:$0xff] }
  0xcd   :  { %v890_v25 = vmul.f32 %v3958_v29, %v3957_v24  ;;  %v989_v56 = vadd.f32 %v889_v26, %v789_v3  ;;  %v891_v63 = vmul.f32 %v3962_v12, %v3961_v19  ;;  %v3963_v43 = vld [vmem:[#allocation92_spill] sm:$0xff]  ;;  %v3966_v8 = vld [vmem:[#allocation99_spill] sm:$0xff]  ;;  %1087 = vst.msk [vmem:[#allocation6 + $0x198] sm:$0xff] %vm636_vm0, %v987_v49  ;;  %1088 = vst [vmem:[#allocation6 + $0x1a0] sm:$0xff] %v988_v37 }
  0xce   :  { %v3964_v51 = vld [vmem:[#allocation100_spill] sm:$0xff]  ;;  %v3967_v39 = vld [vmem:[#allocation97_spill] sm:$0xff]  ;;  %v3969_v46 = vld [vmem:[#allocation98_spill] sm:$0xff] }
  0xcf   :  { %v792_v53 = vmul.f32 %v3964_v51, %v3963_v43  ;;  %v3965_v18 = vld [vmem:[#allocation96_spill] sm:$0xff]  ;;  %v990_v2 = vadd.f32 %v890_v25, %v790_v47  ;;  %v3968_v10 = vld [vmem:[#allocation105_spill] sm:$0xff]  ;;  %v3971_v44 = vld [vmem:[#allocation102_spill] sm:$0xff]  ;;  %1089 = vst.msk [vmem:[#allocation6 + $0x1a8] sm:$0xff] %vm636_vm0, %v989_v56  ;;  %v991_v33 = vadd.f32 %v891_v63, %v791_v17 }
  0xd0   :  { %v892_v1 = vmul.f32 %v3966_v8, %v3965_v18  ;;  %v793_v31 = vmul.f32 %v3968_v10, %v3967_v39  ;;  %v3970_v61 = vld [vmem:[#allocation101_spill] sm:$0xff]  ;;  %v3972_v32 = vld [vmem:[#allocation110_spill] sm:$0xff]  ;;  %v3973_v9 = vld [vmem:[#allocation103_spill] sm:$0xff] }
  0xd1   :  { %v893_v55 = vmul.f32 %v3970_v61, %v3969_v46  ;;  %v794_v13 = vmul.f32 %v3972_v32, %v3971_v44  ;;  %v3974_v54 = vld [vmem:[#allocation106_spill] sm:$0xff]  ;;  %v3975_v40 = vld [vmem:[#allocation104_spill] sm:$0xff]  ;;  %1090 = vst [vmem:[#allocation6 + $0x1b0] sm:$0xff] %v990_v2  ;;  %v3977_v41 = vld [vmem:[#allocation107_spill] sm:$0xff] }
  0xd2   :  { %v992_v16 = vadd.f32 %v892_v1, %v792_v53  ;;  %v894_v7 = vmul.f32 %v3974_v54, %v3973_v9  ;;  %v3976_v23 = vld [vmem:[#allocation112_spill] sm:$0xff]  ;;  %v3978_v3 = vld [vmem:[#allocation111_spill] sm:$0xff]  ;;  %v3981_v22 = vld [vmem:[#allocation109_spill] sm:$0xff]  ;;  %1091 = vst.msk [vmem:[#allocation6 + $0x1b8] sm:$0xff] %vm636_vm0, %v991_v33 }
  0xd3   :  { %v795_v28 = vmul.f32 %v3976_v23, %v3975_v40  ;;  %v993_v6 = vadd.f32 %v893_v55, %v793_v31  ;;  %v895_v57 = vmul.f32 %v3978_v3, %v3977_v41  ;;  %v3979_v48 = vld [vmem:[#allocation108_spill] sm:$0xff]  ;;  %v3982_v47 = vld [vmem:[#allocation115_spill] sm:$0xff]  ;;  %v1196_v24 = vld [vmem:[%s3548_s1 + $0x58] sm:$0xff] }
  0xd4   :  { %v3980_v26 = vld [vmem:[#allocation116_spill] sm:$0xff]  ;;  %v896_v49 = vmul.f32 %v3982_v47, %v3981_v22  ;;  %1092 = vst [vmem:[#allocation6 + $0x1c0] sm:$0xff] %v992_v16  ;;  %v994_v37 = vadd.f32 %v894_v7, %v794_v13  ;;  %v3983_v29 = vld [vmem:[#allocation113_spill] sm:$0xff]  ;;  %v1197_v60 = vld [vmem:[%s3547_s0 + $0x58] sm:$0xff] }
  0xd5   :  { %v796_v4 = vmul.f32 %v3980_v26, %v3979_v48  ;;  %v797_v25 = vmul.f32 %v1196_v24, %v3983_v29  ;;  %v897_v34 = vmul.f32 %v1197_v60, %v2638_v59  ;;  %v1198_v17 = vld [vmem:[%s3548_s1 + $0x60] sm:$0xff]  ;;  %v3984_v56 = vld [vmem:[#allocation114_spill] sm:$0xff]  ;;  %1093 = vst.msk [vmem:[#allocation6 + $0x1c8] sm:$0xff] %vm636_vm0, %v993_v6  ;;  %v995_v12 = vadd.f32 %v895_v57, %v795_v28  ;;  %v3985_v51 = vld [vmem:[#allocation117_spill] sm:$0xff] }
  0xd6   :  { %v798_v19 = vmul.f32 %v1198_v17, %v3984_v56  ;;  %v1199_v43 = vld [vmem:[%s3547_s0 + $0x60] sm:$0xff]  ;;  %v1200_v59 = vld [vmem:[%s3548_s1 + $0x68] sm:$0xff]  ;;  %v3986_v18 = vld [vmem:[#allocation118_spill] sm:$0xff]  ;;  %1094 = vst [vmem:[#allocation6 + $0x1d0] sm:$0xff] %v994_v37 }
  0xd7   :  { %v996_v63 = vadd.f32 %v896_v49, %v796_v4  ;;  %v898_v53 = vmul.f32 %v1199_v43, %v3985_v51  ;;  %v799_v8 = vmul.f32 %v1200_v59, %v3986_v18  ;;  %v997_v1 = vadd.f32 %v897_v34, %v797_v25  ;;  %v1201_v2 = vld [vmem:[%s3547_s0 + $0x68] sm:$0xff]  ;;  %v3987_v39 = vld [vmem:[#allocation119_spill] sm:$0xff]  ;;  %v1202_v31 = vld [vmem:[%s3548_s1 + $0x70] sm:$0xff]  ;;  %1095 = vst.msk [vmem:[#allocation6 + $0x1d8] sm:$0xff] %vm636_vm0, %v995_v12 }
  0xd8   :  { %v899_v10 = vmul.f32 %v1201_v2, %v3987_v39  ;;  %v3988_v46 = vld [vmem:[#allocation120_spill] sm:$0xff]  ;;  %v1203_v55 = vld [vmem:[%s3547_s0 + $0x70] sm:$0xff]  ;;  %v1204_v33 = vld [vmem:[%s3548_s1 + $0x78] sm:$0xff] }
  0xd9   :  { %v800_v61 = vmul.f32 %v1202_v31, %v3988_v46  ;;  %v3989_v44 = vld [vmem:[#allocation121_spill] sm:$0xff]  ;;  %1096 = vst [vmem:[#allocation6 + $0x1e0] sm:$0xff] %v996_v63  ;;  %v998_v13 = vadd.f32 %v898_v53, %v798_v19  ;;  %v3990_v16 = vld [vmem:[#allocation122_spill] sm:$0xff]  ;;  %v3991_v7 = vld [vmem:[#allocation123_spill] sm:$0xff] }
  0xda   :  { %v900_v32 = vmul.f32 %v1203_v55, %v3989_v44  ;;  %v801_v9 = vmul.f32 %v1204_v33, %v3990_v16  ;;  %v1205_v54 = vld [vmem:[%s3547_s0 + $0x78] sm:$0xff]  ;;  %v1206_v23 = vld [vmem:[%s3548_s1 + $0x80] sm:$0xff]  ;;  %v3992_v28 = vld [vmem:[#allocation124_spill] sm:$0xff]  ;;  %1097 = vst.msk [vmem:[#allocation6 + $0x1e8] sm:$0xff] %vm636_vm0, %v997_v1  ;;  %v999_v41 = vadd.f32 %v899_v10, %v799_v8 }
  0xdb   :  { %v901_v40 = vmul.f32 %v1205_v54, %v3991_v7  ;;  %v802_v6 = vmul.f32 %v1206_v23, %v3992_v28  ;;  %v1207_v57 = vld [vmem:[%s3547_s0 + $0x80] sm:$0xff]  ;;  %v3993_v48 = vld [vmem:[#allocation125_spill] sm:$0xff]  ;;  %v1208_v4 = vld [vmem:[%s3548_s1 + $0x88] sm:$0xff]  ;;  %1098 = vst [vmem:[#allocation6 + $0x1f0] sm:$0xff] %v998_v13 }
  0xdc   :  { %v1000_v3 = vadd.f32 %v900_v32, %v800_v61  ;;  %v902_v26 = vmul.f32 %v1207_v57, %v3993_v48  ;;  %v3994_v22 = vld [vmem:[#allocation11_spill] sm:$0xff]  ;;  %v1209_v37 = vld [vmem:[%s3547_s0 + $0x88] sm:$0xff]  ;;  %v3995_v24 = vld [vmem:[#allocation126_spill] sm:$0xff]  ;;  %1099 = vst.msk [vmem:[#allocation6 + $0x1f8] sm:$0xff] %vm636_vm0, %v999_v41 }
  0xdd   :  { %v803_v47 = vmul.f32 %v1208_v4, %v3994_v22  ;;  %v1001_v49 = vadd.f32 %v901_v40, %v801_v9  ;;  %v903_v29 = vmul.f32 %v1209_v37, %v3995_v24  ;;  %v1210_v25 = vld [vmem:[%s3548_s1 + $0x90] sm:$0xff]  ;;  %v3996_v60 = vld [vmem:[#allocation127_spill] sm:$0xff]  ;;  %v3997_v56 = vld [vmem:[#allocation12_spill] sm:$0xff] }
  0xde   :  { %v804_v34 = vmul.f32 %v1210_v25, %v3996_v60  ;;  %v1211_v17 = vld [vmem:[%s3547_s0 + $0x90] sm:$0xff]  ;;  %1100 = vst [vmem:[#allocation6 + $0x200] sm:$0xff] %v1000_v3  ;;  %v1002_v12 = vadd.f32 %v902_v26, %v802_v6  ;;  %v1212_v63 = vld [vmem:[%s3548_s1 + $0x98] sm:$0xff]  ;;  %v3999_v59 = vld [vmem:[#allocation128_spill] sm:$0xff] }
  0xdf   :  { %v904_v19 = vmul.f32 %v1211_v17, %v3997_v56  ;;  %v3998_v43 = vld [vmem:[#allocation13_spill] sm:$0xff]  ;;  %v1213_v53 = vld [vmem:[%s3547_s0 + $0x98] sm:$0xff]  ;;  %v1214_v8 = vld [vmem:[%s3548_s1 + $0xa0] sm:$0xff]  ;;  %1101 = vst.msk [vmem:[#allocation6 + $0x208] sm:$0xff] %vm636_vm0, %v1001_v49  ;;  %v1003_v39 = vadd.f32 %v903_v29, %v803_v47 }
  0xe0   :  { %v805_v51 = vmul.f32 %v1212_v63, %v3998_v43  ;;  %v905_v18 = vmul.f32 %v1213_v53, %v3999_v59  ;;  %v4000_v1 = vld [vmem:[#allocation14_spill] sm:$0xff]  ;;  %v1215_v31 = vld [vmem:[%s3547_s0 + $0xa0] sm:$0xff]  ;;  %v1216_v55 = vld [vmem:[%s3548_s1 + $0xa8] sm:$0xff]  ;;  %1102 = vst [vmem:[#allocation6 + $0x210] sm:$0xff] %v1002_v12 }
  0xe1   :  { %v806_v2 = vmul.f32 %v1214_v8, %v4000_v1  ;;  %v1004_v10 = vadd.f32 %v904_v19, %v804_v34  ;;  %v4001_v46 = vld [vmem:[#allocation15_spill] sm:$0xff]  ;;  %v4002_v44 = vld [vmem:[#allocation16_spill] sm:$0xff]  ;;  %v4003_v16 = vld [vmem:[#allocation17_spill] sm:$0xff]  ;;  %1103 = vst.msk [vmem:[#allocation6 + $0x218] sm:$0xff] %vm636_vm0, %v1003_v39 }
  0xe2   :  { %v906_v61 = vmul.f32 %v1215_v31, %v4001_v46  ;;  %v807_v32 = vmul.f32 %v1216_v55, %v4002_v44  ;;  %v1005_v13 = vadd.f32 %v905_v18, %v805_v51  ;;  %v1217_v33 = vld [vmem:[%s3547_s0 + $0xa8] sm:$0xff]  ;;  %v1218_v54 = vld [vmem:[%s3548_s1 + $0xb0] sm:$0xff]  ;;  %v4004_v7 = vld [vmem:[#allocation18_spill] sm:$0xff] }
  0xe3   :  { %v907_v9 = vmul.f32 %v1217_v33, %v4003_v16  ;;  %v808_v40 = vmul.f32 %v1218_v54, %v4004_v7  ;;  %v1219_v23 = vld [vmem:[%s3547_s0 + $0xb0] sm:$0xff]  ;;  %v4005_v28 = vld [vmem:[#allocation19_spill] sm:$0xff]  ;;  %1104 = vst [vmem:[#allocation6 + $0x220] sm:$0xff] %v1004_v10  ;;  %v1220_v3 = vld [vmem:[%s3548_s1 + $0xb8] sm:$0xff] }
  0xe4   :  { %v908_v6 = vmul.f32 %v1219_v23, %v4005_v28  ;;  %v1006_v41 = vadd.f32 %v906_v61, %v806_v2  ;;  %v4006_v57 = vld [vmem:[#allocation20_spill] sm:$0xff]  ;;  %v1221_v26 = vld [vmem:[%s3547_s0 + $0xb8] sm:$0xff]  ;;  %v4007_v4 = vld [vmem:[#allocation21_spill] sm:$0xff]  ;;  %1105 = vst.msk [vmem:[#allocation6 + $0x228] sm:$0xff] %vm636_vm0, %v1005_v13 }
  0xe5   :  { %v809_v48 = vmul.f32 %v1220_v3, %v4006_v57  ;;  %v909_v22 = vmul.f32 %v1221_v26, %v4007_v4  ;;  %v1222_v47 = vld [vmem:[%s3548_s1 + $0xc0] sm:$0xff]  ;;  %v4008_v49 = vld [vmem:[#allocation129_spill] sm:$0xff]  ;;  %v1007_v24 = vadd.f32 %v907_v9, %v807_v32  ;;  %v4009_v60 = vld [vmem:[#allocation22_spill] sm:$0xff] }
  0xe6   :  { %v810_v37 = vmul.f32 %v1222_v47, %v4008_v49  ;;  %v1008_v29 = vadd.f32 %v908_v6, %v808_v40  ;;  %v1223_v25 = vld [vmem:[%s3547_s0 + $0xc0] sm:$0xff]  ;;  %v1224_v17 = vld [vmem:[%s3548_s1 + $0xc8] sm:$0xff]  ;;  %1106 = vst [vmem:[#allocation6 + $0x230] sm:$0xff] %v1006_v41  ;;  %v1226_v53 = vld [vmem:[%s3548_s1 + $0xd0] sm:$0xff] }
  0xe7   :  { %v910_v34 = vmul.f32 %v1223_v25, %v4009_v60  ;;  %v4010_v56 = vld [vmem:[#allocation23_spill] sm:$0xff]  ;;  %v1009_v12 = vadd.f32 %v909_v22, %v809_v48  ;;  %v1225_v63 = vld [vmem:[%s3547_s0 + $0xc8] sm:$0xff]  ;;  %v4012_v59 = vld [vmem:[#allocation25_spill] sm:$0xff]  ;;  %1107 = vst.msk [vmem:[#allocation6 + $0x238] sm:$0xff] %vm636_vm0, %v1007_v24 }
  0xe8   :  { %v811_v19 = vmul.f32 %v1224_v17, %v4010_v56  ;;  %v4011_v43 = vld [vmem:[#allocation24_spill] sm:$0xff]  ;;  %v812_v18 = vmul.f32 %v1226_v53, %v4012_v59  ;;  %v1227_v8 = vld [vmem:[%s3547_s0 + $0xd0] sm:$0xff]  ;;  %v4013_v1 = vld [vmem:[#allocation26_spill] sm:$0xff]  ;;  %1108 = vst [vmem:[#allocation6 + $0x240] sm:$0xff] %v1008_v29 }
  0xe9   :  { %v911_v51 = vmul.f32 %v1225_v63, %v4011_v43  ;;  %v912_v2 = vmul.f32 %v1227_v8, %v4013_v1  ;;  %v1010_v39 = vadd.f32 %v910_v34, %v810_v37  ;;  %v1228_v10 = vld [vmem:[%s3548_s1 + $0xd8] sm:$0xff]  ;;  %v4014_v31 = vld [vmem:[#allocation27_spill] sm:$0xff]  ;;  %v4015_v32 = vld [vmem:[#allocation28_spill] sm:$0xff]  ;;  %1109 = vst.msk [vmem:[#allocation6 + $0x248] sm:$0xff] %vm636_vm0, %v1009_v12 }
  0xea   :  { %v813_v46 = vmul.f32 %v1228_v10, %v4014_v31  ;;  %v1229_v61 = vld [vmem:[%s3547_s0 + $0xd8] sm:$0xff]  ;;  %v1230_v44 = vld [vmem:[%s3548_s1 + $0xe0] sm:$0xff]  ;;  %v1233_v23 = vld [vmem:[%s3547_s0 + $0xe8] sm:$0xff] }
  0xeb   :  { %v913_v55 = vmul.f32 %v1229_v61, %v2825_v21  ;;  %v814_v13 = vmul.f32 %v1230_v44, %v4015_v32  ;;  %v1011_v33 = vadd.f32 %v911_v51, %v811_v19  ;;  %v1012_v16 = vadd.f32 %v912_v2, %v812_v18  ;;  %v1231_v9 = vld [vmem:[%s3547_s0 + $0xe0] sm:$0xff]  ;;  %v1232_v21 = vld [vmem:[%s3548_s1 + $0xe8] sm:$0xff]  ;;  %1110 = vst [vmem:[#allocation6 + $0x250] sm:$0xff] %v1010_v39  ;;  %v1234_v6 = vld [vmem:[%s3548_s1 + $0xf0] sm:$0xff] }
  0xec   :  { %v914_v54 = vmul.f32 %v1231_v9, %v2839_v50  ;;  %v815_v7 = vmul.f32 %v1232_v21, %v2844_v15  ;;  %v915_v28 = vmul.f32 %v1233_v23, %v2846_v42  ;;  %v816_v50 = vmul.f32 %v1234_v6, %v2858_v30  ;;  %v1235_v41 = vld [vmem:[%s3547_s0 + $0xf0] sm:$0xff]  ;;  %v1236_v42 = vld [vmem:[%s3548_s1 + $0xf8] sm:$0xff]  ;;  %v1239_v49 = vld [vmem:[%s3547_s0 + $0x100] sm:$0xff] }
  0xed   :  { %v1013_v40 = vadd.f32 %v913_v55, %v813_v46  ;;  %v916_v15 = vmul.f32 %v1235_v41, %v2860_v36  ;;  %1111 = vst.msk [vmem:[#allocation6 + $0x258] sm:$0xff] %vm636_vm0, %v1011_v33  ;;  %1112 = vst [vmem:[#allocation6 + $0x260] sm:$0xff] %v1012_v16  ;;  %v4016_v57 = vld [vmem:[#allocation29_spill] sm:$0xff]  ;;  %v1237_v30 = vld [vmem:[%s3547_s0 + $0xf8] sm:$0xff]  ;;  %v918_v37 = vmul.f32 %v1239_v49, %v2885_v0 }
  0xee   :  { %v1014_v3 = vadd.f32 %v914_v54, %v814_v13  ;;  %v817_v48 = vmul.f32 %v1236_v42, %v4016_v57  ;;  %v917_v26 = vmul.f32 %v1237_v30, %v2871_v5  ;;  %v1238_v36 = vld [vmem:[%s3548_s1 + $0x100] sm:$0xff]  ;;  %v1015_v22 = vadd.f32 %v915_v28, %v815_v7  ;;  %v1240_v5 = vld [vmem:[%s3548_s1 + $0x108] sm:$0xff]  ;;  %v1242_v60 = vld [vmem:[%s3548_s1 + $0x110] sm:$0xff] }
  0xef   :  { %v818_v4 = vmul.f32 %v1238_v36, %v2876_v45  ;;  %1113 = vst.msk [vmem:[#allocation6 + $0x268] sm:$0xff] %vm636_vm0, %v1013_v40  ;;  %v1016_v47 = vadd.f32 %v916_v15, %v816_v50  ;;  %v819_v24 = vmul.f32 %v1240_v5, %v2890_v38  ;;  %v1241_v45 = vld [vmem:[%s3547_s0 + $0x108] sm:$0xff]  ;;  %v820_v0 = vmul.f32 %v1242_v60, %v2904_v20  ;;  %v1243_v34 = vld [vmem:[%s3547_s0 + $0x110] sm:$0xff]  ;;  %v1245_v20 = vld [vmem:[%s3547_s0 + $0x118] sm:$0xff] }
  0xf0   :  { %1114 = vst [vmem:[#allocation6 + $0x270] sm:$0xff] %v1014_v3  ;;  %v1017_v29 = vadd.f32 %v917_v26, %v817_v48  ;;  %v919_v25 = vmul.f32 %v1241_v45, %v2892_v58  ;;  %v920_v38 = vmul.f32 %v1243_v34, %v2906_v35  ;;  %1115 = vst.msk [vmem:[#allocation6 + $0x278] sm:$0xff] %vm636_vm0, %v1015_v22  ;;  %v1244_v58 = vld [vmem:[%s3548_s1 + $0x118] sm:$0xff]  ;;  %v1246_v35 = vld [vmem:[%s3548_s1 + $0x120] sm:$0xff] }
  0xf1   :  { %1116 = vst [vmem:[#allocation6 + $0x280] sm:$0xff] %v1016_v47  ;;  %v1018_v17 = vadd.f32 %v918_v37, %v818_v4  ;;  %v821_v56 = vmul.f32 %v1244_v58, %v2911_v52  ;;  %v921_v19 = vmul.f32 %v1245_v20, %v2917_v14  ;;  %v822_v12 = vmul.f32 %v1246_v35, %v2922_v62  ;;  %v1247_v52 = vld [vmem:[%s3547_s0 + $0x120] sm:$0xff]  ;;  %v1248_v14 = vld [vmem:[%s3548_s1 + $0x128] sm:$0xff]  ;;  %v4017_v53 = vld [vmem:[#allocation30_spill] sm:$0xff] }
  0xf2   :  { %1117 = vst.msk [vmem:[#allocation6 + $0x288] sm:$0xff] %vm636_vm0, %v1017_v29  ;;  %v1019_v63 = vadd.f32 %v919_v25, %v819_v24  ;;  %v1020_v43 = vadd.f32 %v920_v38, %v820_v0  ;;  %v922_v51 = vmul.f32 %v1247_v52, %v2931_v11  ;;  %v823_v59 = vmul.f32 %v1248_v14, %v4017_v53  ;;  %v1249_v62 = vld [vmem:[%s3547_s0 + $0x128] sm:$0xff]  ;;  %v4018_v8 = vld [vmem:[#allocation31_spill] sm:$0xff]  ;;  %v1250_v2 = vld [vmem:[%s3548_s1 + $0x130] sm:$0xff] }
  0xf3   :  { %1118 = vst [vmem:[#allocation6 + $0x290] sm:$0xff] %v1018_v17  ;;  %v1021_v18 = vadd.f32 %v921_v19, %v821_v56  ;;  %v923_v1 = vmul.f32 %v1249_v62, %v4018_v8  ;;  %v4019_v39 = vld [vmem:[#allocation32_spill] sm:$0xff]  ;;  %v1251_v10 = vld [vmem:[%s3547_s0 + $0x130] sm:$0xff]  ;;  %v1252_v55 = vld [vmem:[%s3548_s1 + $0x138] sm:$0xff] }
  0xf4   :  { %v824_v11 = vmul.f32 %v1250_v2, %v4019_v39  ;;  %v4020_v31 = vld [vmem:[#allocation33_spill] sm:$0xff]  ;;  %1119 = vst.msk [vmem:[#allocation6 + $0x298] sm:$0xff] %vm636_vm0, %v1019_v63  ;;  %1120 = vst [vmem:[#allocation6 + $0x2a0] sm:$0xff] %v1020_v43  ;;  %v1022_v61 = vadd.f32 %v922_v51, %v822_v12  ;;  %v4021_v44 = vld [vmem:[#allocation34_spill] sm:$0xff] }
  0xf5   :  { %v924_v46 = vmul.f32 %v1251_v10, %v4020_v31  ;;  %v825_v32 = vmul.f32 %v1252_v55, %v4021_v44  ;;  %v1253_v13 = vld [vmem:[%s3547_s0 + $0x138] sm:$0xff]  ;;  %v4022_v33 = vld [vmem:[#allocation35_spill] sm:$0xff]  ;;  %v4023_v54 = vld [vmem:[#allocation36_spill] sm:$0xff]  ;;  %1121 = vst.msk [vmem:[#allocation6 + $0x2a8] sm:$0xff] %vm636_vm0, %v1021_v18  ;;  %v1023_v7 = vadd.f32 %v923_v1, %v823_v59 }
  0xf6   :  { %v925_v16 = vmul.f32 %v1253_v13, %v4022_v33  ;;  %v1254_v9 = vld [vmem:[%s3548_s1 + $0x140] sm:$0xff]  ;;  %v4024_v28 = vld [vmem:[#allocation37_spill] sm:$0xff]  ;;  %v1256_v50 = vld [vmem:[%s3548_s1 + $0x148] sm:$0xff]  ;;  %1122 = vst [vmem:[#allocation6 + $0x2b0] sm:$0xff] %v1022_v61 }
  0xf7   :  { %v826_v21 = vmul.f32 %v1254_v9, %v4023_v54  ;;  %v1024_v40 = vadd.f32 %v924_v46, %v824_v11  ;;  %v1255_v23 = vld [vmem:[%s3547_s0 + $0x140] sm:$0xff]  ;;  %v4025_v41 = vld [vmem:[#allocation38_spill] sm:$0xff]  ;;  %v1257_v42 = vld [vmem:[%s3547_s0 + $0x148] sm:$0xff]  ;;  %1123 = vst.msk [vmem:[#allocation6 + $0x2b8] sm:$0xff] %vm636_vm0, %v1023_v7 }
  0xf8   :  { %v926_v6 = vmul.f32 %v1255_v23, %v4024_v28  ;;  %v827_v15 = vmul.f32 %v1256_v50, %v4025_v41  ;;  %v1025_v3 = vadd.f32 %v925_v16, %v825_v32  ;;  %v4026_v57 = vld [vmem:[#allocation39_spill] sm:$0xff]  ;;  %v1258_v30 = vld [vmem:[%s3548_s1 + $0x150] sm:$0xff]  ;;  %v4027_v26 = vld [vmem:[#allocation40_spill] sm:$0xff] }
  0xf9   :  { %v927_v48 = vmul.f32 %v1257_v42, %v4026_v57  ;;  %v828_v36 = vmul.f32 %v1258_v30, %v4027_v26  ;;  %v1259_v4 = vld [vmem:[%s3547_s0 + $0x150] sm:$0xff]  ;;  %v4028_v22 = vld [vmem:[#allocation130_spill] sm:$0xff]  ;;  %1124 = vst [vmem:[#allocation6 + $0x2c0] sm:$0xff] %v1024_v40  ;;  %v4029_v5 = vld [vmem:[#allocation131_spill] sm:$0xff] }
  0xfa   :  { %v928_v47 = vmul.f32 %v1259_v4, %v4028_v22  ;;  %v1026_v49 = vadd.f32 %v926_v6, %v826_v21  ;;  %v1260_v37 = vld [vmem:[%s3548_s1 + $0x158] sm:$0xff]  ;;  %v4030_v45 = vld [vmem:[#allocation132_spill] sm:$0xff]  ;;  %v1262_v60 = vld [vmem:[%s3548_s1 + $0x160] sm:$0xff]  ;;  %1125 = vst.msk [vmem:[#allocation6 + $0x2c8] sm:$0xff] %vm636_vm0, %v1025_v3 }
  0xfb   :  { %v829_v24 = vmul.f32 %v1260_v37, %v4029_v5  ;;  %v1261_v29 = vld [vmem:[%s3547_s0 + $0x158] sm:$0xff]  ;;  %v4031_v0 = vld [vmem:[#allocation133_spill] sm:$0xff]  ;;  %v1027_v38 = vadd.f32 %v927_v48, %v827_v15  ;;  %v1263_v58 = vld [vmem:[%s3547_s0 + $0x160] sm:$0xff] }
  0xfc   :  { %v929_v25 = vmul.f32 %v1261_v29, %v4030_v45  ;;  %v830_v34 = vmul.f32 %v1262_v60, %v4031_v0  ;;  %v1028_v17 = vadd.f32 %v928_v47, %v828_v36  ;;  %v4032_v56 = vld [vmem:[#allocation45_spill] sm:$0xff]  ;;  %v1264_v19 = vld [vmem:[%s3548_s1 + $0x168] sm:$0xff]  ;;  %v4033_v35 = vld [vmem:[#allocation134_spill] sm:$0xff]  ;;  %1126 = vst [vmem:[#allocation6 + $0x2d0] sm:$0xff] %v1026_v49 }
  0xfd   :  { %v930_v20 = vmul.f32 %v1263_v58, %v4032_v56  ;;  %v831_v12 = vmul.f32 %v1264_v19, %v4033_v35  ;;  %v1265_v43 = vld [vmem:[%s3547_s0 + $0x168] sm:$0xff]  ;;  %v4034_v52 = vld [vmem:[#allocation135_spill] sm:$0xff]  ;;  %v1266_v14 = vld [vmem:[%s3548_s1 + $0x170] sm:$0xff]  ;;  %1127 = vst.msk [vmem:[#allocation6 + $0x2d8] sm:$0xff] %vm636_vm0, %v1027_v38 }
  0xfe   :  { %v1029_v63 = vadd.f32 %v929_v25, %v829_v24  ;;  %v931_v51 = vmul.f32 %v1265_v43, %v4034_v52  ;;  %v832_v53 = vmul.f32 %v1266_v14, %v3042_v27  ;;  %v1267_v59 = vld [vmem:[%s3547_s0 + $0x170] sm:$0xff]  ;;  %v4035_v18 = vld [vmem:[#allocation136_spill] sm:$0xff]  ;;  %1128 = vst [vmem:[#allocation6 + $0x2e0] sm:$0xff] %v1028_v17  ;;  %v1268_v1 = vld [vmem:[%s3548_s1 + $0x178] sm:$0xff] }
  0xff   :  { %v932_v62 = vmul.f32 %v1267_v59, %v4035_v18  ;;  %v1030_v8 = vadd.f32 %v930_v20, %v830_v34  ;;  %v4036_v2 = vld [vmem:[#allocation137_spill] sm:$0xff]  ;;  %v1269_v27 = vld [vmem:[%s3547_s0 + $0x178] sm:$0xff]  ;;  %v1270_v31 = vld [vmem:[%s3548_s1 + $0x180] sm:$0xff] }
 0x100   :  { %v833_v39 = vmul.f32 %v1268_v1, %v4036_v2  ;;  %v4037_v11 = vld [vmem:[#allocation50_spill] sm:$0xff]  ;;  %1129 = vst.msk [vmem:[#allocation6 + $0x2e8] sm:$0xff] %vm636_vm0, %v1029_v63  ;;  %v1031_v55 = vadd.f32 %v931_v51, %v831_v12  ;;  %v1271_v32 = vld [vmem:[%s3547_s0 + $0x180] sm:$0xff]  ;;  %v1272_v16 = vld [vmem:[%s3548_s1 + $0x188] sm:$0xff]  ;;  %s1314_s1 = scalar_lea.vmem %s1154_s14, 12800 }
 0x101   :  { %v933_v10 = vmul.f32 %v1269_v27, %v4037_v11  ;;  %v4038_v46 = vld [vmem:[#allocation138_spill] sm:$0xff]  ;;  %v1032_v44 = vadd.f32 %v932_v62, %v832_v53  ;;  %v4039_v13 = vld [vmem:[#allocation139_spill] sm:$0xff]  ;;  %v4040_v9 = vld [vmem:[#allocation140_spill] sm:$0xff]  ;;  %1130 = vst [vmem:[#allocation6 + $0x2f0] sm:$0xff] %v1030_v8  ;;  %p1315_p10 = scmp.ne.s32.totalorder %s1154_s14, %s1314_s1  ;;  %p1320_p12 = scmp.lt.s32.totalorder %s1314_s1, %s1314_s1 }
 0x102   :  { %v834_v61 = vmul.f32 %v1270_v31, %v4038_v46  ;;  %v934_v33 = vmul.f32 %v1271_v32, %v4039_v13  ;;  %v835_v54 = vmul.f32 %v1272_v16, %v4040_v9  ;;  %v1273_v7 = vld [vmem:[%s3547_s0 + $0x188] sm:$0xff]  ;;  %v4041_v40 = vld [vmem:[#allocation141_spill] sm:$0xff]  ;;  %1131 = vst.msk [vmem:[#allocation6 + $0x2f8] sm:$0xff] %vm636_vm0, %v1031_v55 }
 0x103   :  { %v1033_v21 = vadd.f32 %v933_v10, %v833_v39  ;;  %v935_v23 = vmul.f32 %v1273_v7, %v4041_v40  ;;  %1132 = vst [vmem:[#allocation6 + $0x300] sm:$0xff] %v1032_v44  ;;  %p1321_p13 = por %p1320_p12, %p1319_p11 }
 0x104   :  { %v1034_v28 = vadd.f32 %v934_v33, %v834_v61 }
 0x105   :  { %1133 = vst.msk [vmem:[#allocation6 + $0x308] sm:$0xff] %vm636_vm0, %v1033_v21  ;;  %v1035_v6 = vadd.f32 %v935_v23, %v835_v54  ;;  %p1322_p0 = pnand %p1321_p13, %p1315_p10 }
 0x106   :  { %1134 = vst [vmem:[#allocation6 + $0x310] sm:$0xff] %v1034_v28 }
 0x107   :  { %1135 = vst.msk [vmem:[#allocation6 + $0x318] sm:$0xff] %vm636_vm0, %v1035_v6 }
 0x108   :  { %1325 = shalt.err (!%p1322_p0)
}
 0x109   :  { %1159 = dma.vmem_to_hbm [thread:$0]  %s1154_s14, 12800, %s3552_s5, [#allocation7], %s1341_s21, %s1341_s21, %s1342_s22  }
 0x10a   :  { %1336 = dma.done.wait [#allocation4], 12800  }
 0x10b   :  { %1337 = vsyncadd [#allocation4], 4294954496 }
 0x10c   :  { %1338 = dma.done.wait [#allocation7], 12800  }
 0x10d   :  { %1339 = vsyncadd [#allocation7], 4294954496 }
 0x10e   :  { %1166 = vsyncpa [#allocation3], 1 }
 0x10f   :  { %1167 = vsyncpa [#allocation4], 1 }
 0x110   :  { %1168 = vsyncpa [#allocation7], 1 }

</bundles_post_ra>
